<compile_context>
chip_gen: v6e
topology: v6e:2x2x1
jax: 0.10.0
libtpu: 0.0.40
codegen_flags: <defaults>
</compile_context>

<pallas_src>
import functools

import jax
import jax.numpy as jnp
from jax.experimental import pallas as pl
from jax.experimental.pallas import tpu as pltpu

_LANE = 128
_VMEM_LIMIT_BYTES = 32 * 1024 * 1024


def _round_up(x, m):
    return (x + m - 1) // m * m


def _geometry(H, W, k):
    """Static geometry of the flattened reflect-padded frame."""
    p = (k - 1) // 2
    Hp, Wp = H + 2 * p, W + 2 * p
    # stride-1 valid conv outputs live at flat index j = oh*Wp + ow, j < Lout
    Lout = (H - 1) * Wp + W
    Lacc = _round_up(Lout, _LANE)            # lane-dense accumulator / output length
    shift_max = (k - 1) * (Wp + 1)           # largest tap offset kh*Wp + kw
    Lbuf = _round_up(max(shift_max + Lacc, Hp * Wp + 2), _LANE)
    return p, Hp, Wp, Lout, Lacc, Lbuf


# ----------------------------------------------------------------------------
# In-kernel helper: implicit-GEMM accumulation over the k*k taps.
#   x_ref : (Cin, Lbuf) flat frame (bf16)
#   w_ref : (k*k, Cout, Cin) per-tap weights (bf16)
# returns (Cout, Lacc) f32 accumulator; out[:, j] is the conv at j = oh*Wp+ow.
# ----------------------------------------------------------------------------
def _accum_taps(x_ref, w_ref, k, Wp, lacc):
    cout = w_ref.shape[1]
    acc = jnp.zeros((cout, lacc), jnp.float32)
    for kh in range(k):
        for kw in range(k):
            acc = acc + jnp.dot(
                w_ref[kh * k + kw],
                x_ref[:, pl.ds(kh * Wp + kw, lacc)],
                preferred_element_type=jnp.float32)
    return acc


# ----------------------------------------------------------------------------
# Kernel 1: single conv (+ bias + activation) on one batch element's frame.
# ----------------------------------------------------------------------------
def _conv_act_kernel(x_ref, w_ref, b_ref, o_ref, *, k, Wp, act):
    lacc = o_ref.shape[1]
    y = _accum_taps(x_ref, w_ref, k, Wp, lacc) + b_ref[...]
    if act == "leaky":
        y = jnp.where(y > 0, y, 0.2 * y)          # LeakyReLU(0.2)
    elif act == "relu":
        y = jnp.maximum(y, 0.0)
    o_ref[...] = y.astype(o_ref.dtype)


# ----------------------------------------------------------------------------
# Kernel 2: fused ResnetBlock on one batch element's frame.
#   out = conv2(reflect_pad(relu(conv1(x) + b1))) + b2 + x
# The intermediate h stays in a VMEM scratch frame (never written to HBM).
# ----------------------------------------------------------------------------
def _resblock_kernel(x_ref, cmod_ref, w1_ref, b1_ref, w2_ref, b2_ref,
                     o_ref, h_ref, *, k, H, W, Wp):
    lacc = o_ref.shape[1]
    lbuf = h_ref.shape[1]

    # ---- conv1 + bias + ReLU ------------------------------------------------
    h = jnp.maximum(_accum_taps(x_ref, w1_ref, k, Wp, lacc) + b1_ref[...], 0.0)

    # Place h at the interior of a fresh (Hp, Wp) frame held in VMEM scratch:
    # valid h[oh, ow] (flat j = oh*Wp + ow) goes to frame position j + Wp + 1.
    h_ref[...] = jnp.zeros(h_ref.shape, h_ref.dtype)
    h_ref[:, pl.ds(Wp + 1, lacc)] = h.astype(h_ref.dtype)

    # ---- in-VMEM reflect padding of the h frame (rows first, then cols) -----
    # frame row 0      <- frame row 2        (reflect of interior row 1)
    # frame row H + 1  <- frame row H - 1    (reflect of interior row H)
    h_ref[:, pl.ds(0, Wp)] = h_ref[:, pl.ds(2 * Wp, Wp)]
    h_ref[:, pl.ds((H + 1) * Wp, Wp)] = h_ref[:, pl.ds((H - 1) * Wp, Wp)]
    # columns, done as two lane-dense masked blends (cmod[j] = j % Wp):
    lfix = lbuf - 2
    # col 0 <- col 2  (source value at j + 2)
    cur = h_ref[:, pl.ds(0, lfix)]
    nxt = h_ref[:, pl.ds(2, lfix)]
    is_c0 = cmod_ref[:, pl.ds(0, lfix)] == 0
    h_ref[:, pl.ds(0, lfix)] = jnp.where(is_c0, nxt, cur)
    # col W+1 <- col W-1  (source value at j - 2)
    cur = h_ref[:, pl.ds(2, lfix)]
    prv = h_ref[:, pl.ds(0, lfix)]
    is_cw = cmod_ref[:, pl.ds(2, lfix)] == (W + 1)
    h_ref[:, pl.ds(2, lfix)] = jnp.where(is_cw, prv, cur)

    # ---- conv2 + bias + residual --------------------------------------------
    acc2 = _accum_taps(h_ref, w2_ref, k, Wp, lacc) + b2_ref[...]
    res = x_ref[:, pl.ds(Wp + 1, lacc)].astype(jnp.float32)   # x interior
    o_ref[...] = (acc2 + res).astype(o_ref.dtype)


# ----------------------------------------------------------------------------
# Plain-JAX glue: flat-frame packing / unpacking (cheap, no NCHW<->NHWC swaps).
# ----------------------------------------------------------------------------
def _to_frames(x, k):
    """(N, C, H, W) f32 -> (N, C, Lbuf) bf16 reflect-padded flattened frame."""
    N, C, H, W = x.shape
    p, Hp, Wp, _, _, Lbuf = _geometry(H, W, k)
    if p:
        x = jnp.pad(x, ((0, 0), (0, 0), (p, p), (p, p)), mode="reflect")
    xf = x.reshape(N, C, Hp * Wp)
    xf = jnp.pad(xf, ((0, 0), (0, 0), (0, Lbuf - Hp * Wp)))
    return xf.astype(jnp.bfloat16)


def _from_frames(y, H, W, Wp, Lout):
    """(N, C, Lacc) f32 frame-coordinate output -> (N, C, H, W)."""
    N, C, _ = y.shape
    y = y[:, :, :Lout]
    y = jnp.pad(y, ((0, 0), (0, 0), (0, H * Wp - Lout)))
    return y.reshape(N, C, H, Wp)[:, :, :, :W]


# ----------------------------------------------------------------------------
# Wrappers around pallas_call
# ----------------------------------------------------------------------------
def conv_stage(x, w, b, stride, act="leaky"):
    """x: (N, Cin, H, W) f32; w: (Cout, Cin, k, k) OIHW; b: (Cout,)."""
    N, Cin, H, W = x.shape
    Cout, _, k, _ = w.shape
    _, _, Wp, Lout, Lacc, Lbuf = _geometry(H, W, k)

    xf = _to_frames(x, k)
    wt = jnp.transpose(w, (2, 3, 0, 1)).reshape(k * k, Cout, Cin).astype(jnp.bfloat16)
    bt = b.reshape(Cout, 1).astype(jnp.float32)

    flops = 2 * N * (k * k * Cin) * Cout * Lacc
    bytes_accessed = (N * Cin * Lbuf * 2 + k * k * Cout * Cin * 2
                      + Cout * 4 + N * Cout * Lacc * 4)

    y = pl.pallas_call(
        functools.partial(_conv_act_kernel, k=k, Wp=Wp, act=act),
        out_shape=jax.ShapeDtypeStruct((N, Cout, Lacc), jnp.float32),
        grid=(N,),
        in_specs=[
            pl.BlockSpec((None, Cin, Lbuf), lambda n: (n, 0, 0)),
            pl.BlockSpec((k * k, Cout, Cin), lambda n: (0, 0, 0)),
            pl.BlockSpec((Cout, 1), lambda n: (0, 0)),
        ],
        out_specs=pl.BlockSpec((None, Cout, Lacc), lambda n: (n, 0, 0)),
        compiler_params=pltpu.CompilerParams(
            dimension_semantics=("parallel",),
            vmem_limit_bytes=_VMEM_LIMIT_BYTES),
        cost_estimate=pl.CostEstimate(flops=flops, transcendentals=0,
                                      bytes_accessed=bytes_accessed),
    )(xf, wt, bt)

    y = _from_frames(y, H, W, Wp, Lout)
    if stride > 1:
        y = y[:, :, ::stride, ::stride]   # see TODO(synk) above
    return y


def resblock(x, w1, b1, w2, b2):
    """Fused ResnetBlock: x + conv2(reflect_pad(relu(conv1(x))))."""
    N, C, H, W = x.shape
    k = w1.shape[-1]
    _, _, Wp, Lout, Lacc, Lbuf = _geometry(H, W, k)

    xf = _to_frames(x, k)
    cmod = (jnp.arange(Lbuf, dtype=jnp.int32) % Wp).reshape(1, Lbuf)
    w1t = jnp.transpose(w1, (2, 3, 0, 1)).reshape(k * k, C, C).astype(jnp.bfloat16)
    w2t = jnp.transpose(w2, (2, 3, 0, 1)).reshape(k * k, C, C).astype(jnp.bfloat16)
    b1t = b1.reshape(C, 1).astype(jnp.float32)
    b2t = b2.reshape(C, 1).astype(jnp.float32)

    flops = 2 * 2 * N * (k * k * C) * C * Lacc
    bytes_accessed = (N * C * Lbuf * 2 + Lbuf * 4 + 2 * k * k * C * C * 2
                      + 2 * C * 4 + N * C * Lacc * 4)

    y = pl.pallas_call(
        functools.partial(_resblock_kernel, k=k, H=H, W=W, Wp=Wp),
        out_shape=jax.ShapeDtypeStruct((N, C, Lacc), jnp.float32),
        grid=(N,),
        in_specs=[
            pl.BlockSpec((None, C, Lbuf), lambda n: (n, 0, 0)),
            pl.BlockSpec((1, Lbuf), lambda n: (0, 0)),
            pl.BlockSpec((k * k, C, C), lambda n: (0, 0, 0)),
            pl.BlockSpec((C, 1), lambda n: (0, 0)),
            pl.BlockSpec((k * k, C, C), lambda n: (0, 0, 0)),
            pl.BlockSpec((C, 1), lambda n: (0, 0)),
        ],
        out_specs=pl.BlockSpec((None, C, Lacc), lambda n: (n, 0, 0)),
        scratch_shapes=[pltpu.VMEM((C, Lbuf), jnp.bfloat16)],
        compiler_params=pltpu.CompilerParams(
            dimension_semantics=("parallel",),
            vmem_limit_bytes=_VMEM_LIMIT_BYTES),
        cost_estimate=pl.CostEstimate(flops=flops, transcendentals=0,
                                      bytes_accessed=bytes_accessed),
    )(xf, cmod, w1t, b1t, w2t, b2t)

    return _from_frames(y, H, W, Wp, Lout)


# ----------------------------------------------------------------------------
# Encoder: parameter init + forward
# ----------------------------------------------------------------------------
def init_encoder_params(key, c_in, c_enc, k_enc, nres_enc):
    params = {"conv": [], "res": []}
    c_pre = c_in
    for c, k in zip(c_enc, k_enc):
        key, k1, k2 = jax.random.split(key, 3)
        fan_in = c_pre * k * k
        w = jax.random.normal(k1, (c, c_pre, k, k), jnp.float32) / jnp.sqrt(fan_in)
        b = 0.01 * jax.random.normal(k2, (c,), jnp.float32)
        params["conv"].append((w, b))
        c_pre = c
    for _ in range(nres_enc):
        block = []
        for _ in range(2):
            key, k1, k2 = jax.random.split(key, 3)
            fan_in = c_pre * 9
            w = jax.random.normal(k1, (c_pre, c_pre, 3, 3), jnp.float32) / jnp.sqrt(fan_in)
            b = 0.01 * jax.random.normal(k2, (c_pre,), jnp.float32)
            block.append((w, b))
        params["res"].append(block)
    return params


def encoder_forward(params, x, s_enc):
    # encoder conv stages: reflect-pad conv + LeakyReLU(0.2)
    for (w, b), s in zip(params["conv"], s_enc):
        x = conv_stage(x, w, b, s, act="leaky")
    # resnet blocks (fused kernel): x + conv(relu(conv(x)))
    for (w1, b1), (w2, b2) in params["res"]:
        x = resblock(x, w1, b1, w2, b2)
    return x


# ----------------------------------------------------------------------------
# Pure-JAX f32 reference (lax conv) for verification
# ----------------------------------------------------------------------------
def _reflect_pad_nchw(x, pad):
    if pad == 0:
        return x
    return jnp.pad(x, ((0, 0), (0, 0), (pad, pad), (pad, pad)), mode="reflect")


def _ref_conv(x, w, b, stride, act="none", residual=None):
    pad = (w.shape[-1] - 1) // 2
    xp = _reflect_pad_nchw(x, pad)
    y = jax.lax.conv_general_dilated(
        xp, w, window_strides=(stride, stride), padding="VALID",
        dimension_numbers=("NCHW", "OIHW", "NCHW"))
    y = y + b.reshape(1, -1, 1, 1)
    if act == "leaky":
        y = jnp.where(y > 0, y, 0.2 * y)
    elif act == "relu":
        y = jnp.maximum(y, 0.0)
    if residual is not None:
        y = y + residual
    return y


def _ref_forward(params, x, s_enc):
    for (w, b), s in zip(params["conv"], s_enc):
        x = _ref_conv(x, w, b, s, act="leaky")
    for (w1, b1), (w2, b2) in params["res"]:
        h = _ref_conv(x, w1, b1, 1, act="relu")
        x = _ref_conv(h, w2, b2, 1, act="none", residual=x)
    return x


if __name__ == "__main__":
    args = {"seq2seq": {"ndims": 2, "c_in": 4, "c_enc": [8, 16],
                        "k_enc": [3, 3], "s_enc": [1, 2],
                        "nres_enc": 2, "norm": None}}
    cfg = args["seq2seq"]

    key = jax.random.PRNGKey(0)
    key, xk = jax.random.split(key)
    x = jax.random.normal(xk, (2, cfg["c_in"], 16, 16), jnp.float32)  # NCHW

    params = init_encoder_params(key, cfg["c_in"], cfg["c_enc"],
                                 cfg["k_enc"], cfg["nres_enc"])

    fwd = jax.jit(encoder_forward, static_argnames=("s_enc",))
    out = fwd(params, x, s_enc=tuple(cfg["s_enc"]))
    out = jax.block_until_ready(out)

    ref = _ref_forward(params, x, cfg["s_enc"])
    assert out.shape == (2, 16, 8, 8), out.shape
    # bf16 matmul operands with f32 accumulation: compare in a relative sense.
    err = float(jnp.max(jnp.abs(out - ref)))
    scale = float(jnp.max(jnp.abs(ref)))
    assert err <= 0.05 * scale + 1e-3, (err, scale)

    print("KERNEL_OK")
</pallas_src>

<mosaic_0001>
module attributes {stable_mosaic.version = 11 : i64} {
  func.func @_conv_act_kernel(%arg0: i32, %arg1: memref<1x4x512xbf16, #tpu.memory_space<vmem>>, %arg2: memref<9x8x4xbf16, #tpu.memory_space<vmem>>, %arg3: memref<8x1xf32, #tpu.memory_space<vmem>>, %arg4: memref<1x8x384xf32, #tpu.memory_space<vmem>>) attributes {dimension_semantics = [#tpu.dimension_semantics<parallel>], iteration_bounds = array<i64: 2>, scalar_prefetch = 0 : i64, scratch_operands = 0 : i64, tpu.core_type = #tpu.core_type<tc>, window_params = [{transform_indices = @transform_0, window_bounds = array<i64: 1, 4, 512>}, {pipeline_mode = #tpu.pipeline_mode<synchronous>, transform_indices = @transform_1, window_bounds = array<i64: 9, 8, 4>}, {pipeline_mode = #tpu.pipeline_mode<synchronous>, transform_indices = @transform_2, window_bounds = array<i64: 8, 1>}, {transform_indices = @transform_3, window_bounds = array<i64: 1, 8, 384>}]} {
    %cst = arith.constant 0.000000e+00 : f32
    %0 = vector.broadcast %cst : f32 to vector<8x384xf32>
    %c0 = arith.constant 0 : index
    %c0_0 = arith.constant 0 : index
    %c0_1 = arith.constant 0 : index
    %1 = vector.load %arg2[%c0, %c0_0, %c0_1] : memref<9x8x4xbf16, #tpu.memory_space<vmem>>, vector<1x8x4xbf16>
    %2 = vector.shape_cast %1 : vector<1x8x4xbf16> to vector<8x4xbf16>
    %c0_2 = arith.constant 0 : index
    %c0_3 = arith.constant 0 : index
    %c0_4 = arith.constant 0 : index
    %3 = vector.load %arg1[%c0_2, %c0_3, %c0_4] : memref<1x4x512xbf16, #tpu.memory_space<vmem>>, vector<1x4x384xbf16>
    %4 = vector.shape_cast %3 : vector<1x4x384xbf16> to vector<4x384xbf16>
    %cst_5 = arith.constant dense<0.000000e+00> : vector<8x384xf32>
    %5 = tpu.matmul %2, %4, %cst_5 {dimension_numbers = #tpu.dot_dimension_numbers<[1], [0], [0], [1], [0, 0, 1, 1], [], []>} : vector<8x4xbf16>, vector<4x384xbf16>, vector<8x384xf32> -> vector<8x384xf32>
    %6 = arith.addf %0, %5 : vector<8x384xf32>
    %c1 = arith.constant 1 : index
    %c0_6 = arith.constant 0 : index
    %c0_7 = arith.constant 0 : index
    %7 = vector.load %arg2[%c1, %c0_6, %c0_7] : memref<9x8x4xbf16, #tpu.memory_space<vmem>>, vector<1x8x4xbf16>
    %8 = vector.shape_cast %7 : vector<1x8x4xbf16> to vector<8x4xbf16>
    %c0_8 = arith.constant 0 : index
    %c0_9 = arith.constant 0 : index
    %c1_10 = arith.constant 1 : index
    %9 = vector.load %arg1[%c0_8, %c0_9, %c1_10] : memref<1x4x512xbf16, #tpu.memory_space<vmem>>, vector<1x4x384xbf16>
    %10 = vector.shape_cast %9 : vector<1x4x384xbf16> to vector<4x384xbf16>
    %cst_11 = arith.constant dense<0.000000e+00> : vector<8x384xf32>
    %11 = tpu.matmul %8, %10, %cst_11 {dimension_numbers = #tpu.dot_dimension_numbers<[1], [0], [0], [1], [0, 0, 1, 1], [], []>} : vector<8x4xbf16>, vector<4x384xbf16>, vector<8x384xf32> -> vector<8x384xf32>
    %12 = arith.addf %6, %11 : vector<8x384xf32>
    %c2 = arith.constant 2 : index
    %c0_12 = arith.constant 0 : index
    %c0_13 = arith.constant 0 : index
    %13 = vector.load %arg2[%c2, %c0_12, %c0_13] : memref<9x8x4xbf16, #tpu.memory_space<vmem>>, vector<1x8x4xbf16>
    %14 = vector.shape_cast %13 : vector<1x8x4xbf16> to vector<8x4xbf16>
    %c0_14 = arith.constant 0 : index
    %c0_15 = arith.constant 0 : index
    %c2_16 = arith.constant 2 : index
    %15 = vector.load %arg1[%c0_14, %c0_15, %c2_16] : memref<1x4x512xbf16, #tpu.memory_space<vmem>>, vector<1x4x384xbf16>
    %16 = vector.shape_cast %15 : vector<1x4x384xbf16> to vector<4x384xbf16>
    %cst_17 = arith.constant dense<0.000000e+00> : vector<8x384xf32>
    %17 = tpu.matmul %14, %16, %cst_17 {dimension_numbers = #tpu.dot_dimension_numbers<[1], [0], [0], [1], [0, 0, 1, 1], [], []>} : vector<8x4xbf16>, vector<4x384xbf16>, vector<8x384xf32> -> vector<8x384xf32>
    %18 = arith.addf %12, %17 : vector<8x384xf32>
    %c3 = arith.constant 3 : index
    %c0_18 = arith.constant 0 : index
    %c0_19 = arith.constant 0 : index
    %19 = vector.load %arg2[%c3, %c0_18, %c0_19] : memref<9x8x4xbf16, #tpu.memory_space<vmem>>, vector<1x8x4xbf16>
    %20 = vector.shape_cast %19 : vector<1x8x4xbf16> to vector<8x4xbf16>
    %c0_20 = arith.constant 0 : index
    %c0_21 = arith.constant 0 : index
    %c18 = arith.constant 18 : index
    %21 = vector.load %arg1[%c0_20, %c0_21, %c18] : memref<1x4x512xbf16, #tpu.memory_space<vmem>>, vector<1x4x384xbf16>
    %22 = vector.shape_cast %21 : vector<1x4x384xbf16> to vector<4x384xbf16>
    %cst_22 = arith.constant dense<0.000000e+00> : vector<8x384xf32>
    %23 = tpu.matmul %20, %22, %cst_22 {dimension_numbers = #tpu.dot_dimension_numbers<[1], [0], [0], [1], [0, 0, 1, 1], [], []>} : vector<8x4xbf16>, vector<4x384xbf16>, vector<8x384xf32> -> vector<8x384xf32>
    %24 = arith.addf %18, %23 : vector<8x384xf32>
    %c4 = arith.constant 4 : index
    %c0_23 = arith.constant 0 : index
    %c0_24 = arith.constant 0 : index
    %25 = vector.load %arg2[%c4, %c0_23, %c0_24] : memref<9x8x4xbf16, #tpu.memory_space<vmem>>, vector<1x8x4xbf16>
    %26 = vector.shape_cast %25 : vector<1x8x4xbf16> to vector<8x4xbf16>
    %c0_25 = arith.constant 0 : index
    %c0_26 = arith.constant 0 : index
    %c19 = arith.constant 19 : index
    %27 = vector.load %arg1[%c0_25, %c0_26, %c19] : memref<1x4x512xbf16, #tpu.memory_space<vmem>>, vector<1x4x384xbf16>
    %28 = vector.shape_cast %27 : vector<1x4x384xbf16> to vector<4x384xbf16>
    %cst_27 = arith.constant dense<0.000000e+00> : vector<8x384xf32>
    %29 = tpu.matmul %26, %28, %cst_27 {dimension_numbers = #tpu.dot_dimension_numbers<[1], [0], [0], [1], [0, 0, 1, 1], [], []>} : vector<8x4xbf16>, vector<4x384xbf16>, vector<8x384xf32> -> vector<8x384xf32>
    %30 = arith.addf %24, %29 : vector<8x384xf32>
    %c5 = arith.constant 5 : index
    %c0_28 = arith.constant 0 : index
    %c0_29 = arith.constant 0 : index
    %31 = vector.load %arg2[%c5, %c0_28, %c0_29] : memref<9x8x4xbf16, #tpu.memory_space<vmem>>, vector<1x8x4xbf16>
    %32 = vector.shape_cast %31 : vector<1x8x4xbf16> to vector<8x4xbf16>
    %c0_30 = arith.constant 0 : index
    %c0_31 = arith.constant 0 : index
    %c20 = arith.constant 20 : index
    %33 = vector.load %arg1[%c0_30, %c0_31, %c20] : memref<1x4x512xbf16, #tpu.memory_space<vmem>>, vector<1x4x384xbf16>
    %34 = vector.shape_cast %33 : vector<1x4x384xbf16> to vector<4x384xbf16>
    %cst_32 = arith.constant dense<0.000000e+00> : vector<8x384xf32>
    %35 = tpu.matmul %32, %34, %cst_32 {dimension_numbers = #tpu.dot_dimension_numbers<[1], [0], [0], [1], [0, 0, 1, 1], [], []>} : vector<8x4xbf16>, vector<4x384xbf16>, vector<8x384xf32> -> vector<8x384xf32>
    %36 = arith.addf %30, %35 : vector<8x384xf32>
    %c6 = arith.constant 6 : index
    %c0_33 = arith.constant 0 : index
    %c0_34 = arith.constant 0 : index
    %37 = vector.load %arg2[%c6, %c0_33, %c0_34] : memref<9x8x4xbf16, #tpu.memory_space<vmem>>, vector<1x8x4xbf16>
    %38 = vector.shape_cast %37 : vector<1x8x4xbf16> to vector<8x4xbf16>
    %c0_35 = arith.constant 0 : index
    %c0_36 = arith.constant 0 : index
    %c36 = arith.constant 36 : index
    %39 = vector.load %arg1[%c0_35, %c0_36, %c36] : memref<1x4x512xbf16, #tpu.memory_space<vmem>>, vector<1x4x384xbf16>
    %40 = vector.shape_cast %39 : vector<1x4x384xbf16> to vector<4x384xbf16>
    %cst_37 = arith.constant dense<0.000000e+00> : vector<8x384xf32>
    %41 = tpu.matmul %38, %40, %cst_37 {dimension_numbers = #tpu.dot_dimension_numbers<[1], [0], [0], [1], [0, 0, 1, 1], [], []>} : vector<8x4xbf16>, vector<4x384xbf16>, vector<8x384xf32> -> vector<8x384xf32>
    %42 = arith.addf %36, %41 : vector<8x384xf32>
    %c7 = arith.constant 7 : index
    %c0_38 = arith.constant 0 : index
    %c0_39 = arith.constant 0 : index
    %43 = vector.load %arg2[%c7, %c0_38, %c0_39] : memref<9x8x4xbf16, #tpu.memory_space<vmem>>, vector<1x8x4xbf16>
    %44 = vector.shape_cast %43 : vector<1x8x4xbf16> to vector<8x4xbf16>
    %c0_40 = arith.constant 0 : index
    %c0_41 = arith.constant 0 : index
    %c37 = arith.constant 37 : index
    %45 = vector.load %arg1[%c0_40, %c0_41, %c37] : memref<1x4x512xbf16, #tpu.memory_space<vmem>>, vector<1x4x384xbf16>
    %46 = vector.shape_cast %45 : vector<1x4x384xbf16> to vector<4x384xbf16>
    %cst_42 = arith.constant dense<0.000000e+00> : vector<8x384xf32>
    %47 = tpu.matmul %44, %46, %cst_42 {dimension_numbers = #tpu.dot_dimension_numbers<[1], [0], [0], [1], [0, 0, 1, 1], [], []>} : vector<8x4xbf16>, vector<4x384xbf16>, vector<8x384xf32> -> vector<8x384xf32>
    %48 = arith.addf %42, %47 : vector<8x384xf32>
    %c8 = arith.constant 8 : index
    %c0_43 = arith.constant 0 : index
    %c0_44 = arith.constant 0 : index
    %49 = vector.load %arg2[%c8, %c0_43, %c0_44] : memref<9x8x4xbf16, #tpu.memory_space<vmem>>, vector<1x8x4xbf16>
    %50 = vector.shape_cast %49 : vector<1x8x4xbf16> to vector<8x4xbf16>
    %c0_45 = arith.constant 0 : index
    %c0_46 = arith.constant 0 : index
    %c38 = arith.constant 38 : index
    %51 = vector.load %arg1[%c0_45, %c0_46, %c38] : memref<1x4x512xbf16, #tpu.memory_space<vmem>>, vector<1x4x384xbf16>
    %52 = vector.shape_cast %51 : vector<1x4x384xbf16> to vector<4x384xbf16>
    %cst_47 = arith.constant dense<0.000000e+00> : vector<8x384xf32>
    %53 = tpu.matmul %50, %52, %cst_47 {dimension_numbers = #tpu.dot_dimension_numbers<[1], [0], [0], [1], [0, 0, 1, 1], [], []>} : vector<8x4xbf16>, vector<4x384xbf16>, vector<8x384xf32> -> vector<8x384xf32>
    %54 = arith.addf %48, %53 : vector<8x384xf32>
    %c0_48 = arith.constant 0 : index
    %c0_49 = arith.constant 0 : index
    %55 = vector.load %arg3[%c0_48, %c0_49] : memref<8x1xf32, #tpu.memory_space<vmem>>, vector<8x1xf32>
    %56 = vector.broadcast %55 : vector<8x1xf32> to vector<8x384xf32>
    %57 = arith.addf %54, %56 : vector<8x384xf32>
    %cst_50 = arith.constant 0.000000e+00 : f32
    %58 = vector.broadcast %cst_50 : f32 to vector<8x384xf32>
    %59 = arith.cmpf ogt, %57, %58 : vector<8x384xf32>
    %cst_51 = arith.constant 2.000000e-01 : f32
    %60 = vector.broadcast %cst_51 : f32 to vector<8x384xf32>
    %61 = arith.mulf %60, %57 : vector<8x384xf32>
    %62 = arith.select %59, %57, %61 : vector<8x384xi1>, vector<8x384xf32>
    %c0_52 = arith.constant 0 : index
    %c0_53 = arith.constant 0 : index
    %c0_54 = arith.constant 0 : index
    %63 = vector.load %arg4[%c0_52, %c0_53, %c0_54] : memref<1x8x384xf32, #tpu.memory_space<vmem>>, vector<1x8x384xf32>
    %64 = vector.shape_cast %63 : vector<1x8x384xf32> to vector<8x384xf32>
    %65 = vector.shape_cast %62 : vector<8x384xf32> to vector<1x8x384xf32>
    tpu.vector_store %arg4[%c0_52, %c0_53, %c0_54], %65 {strides = array<i32>} : memref<1x8x384xf32, #tpu.memory_space<vmem>>, vector<1x8x384xf32>,
    return
  }
  func.func @transform_0(%arg0: i32) -> (i32, i32, i32) {
    %c0_i32 = arith.constant 0 : i32
    %c0_i32_0 = arith.constant 0 : i32
    %c0_i32_1 = arith.constant 0 : i32
    return %arg0, %c0_i32, %c0_i32_0 : i32, i32, i32
  }
  func.func @transform_1(%arg0: i32) -> (i32, i32, i32) {
    %c0_i32 = arith.constant 0 : i32
    %c0_i32_0 = arith.constant 0 : i32
    %c0_i32_1 = arith.constant 0 : i32
    %c0_i32_2 = arith.constant 0 : i32
    return %c0_i32, %c0_i32_0, %c0_i32_1 : i32, i32, i32
  }
  func.func @transform_2(%arg0: i32) -> (i32, i32) {
    %c0_i32 = arith.constant 0 : i32
    %c0_i32_0 = arith.constant 0 : i32
    %c0_i32_1 = arith.constant 0 : i32
    return %c0_i32, %c0_i32_0 : i32, i32
  }
  func.func @transform_3(%arg0: i32) -> (i32, i32, i32) {
    %c0_i32 = arith.constant 0 : i32
    %c0_i32_0 = arith.constant 0 : i32
    %c0_i32_1 = arith.constant 0 : i32
    return %arg0, %c0_i32, %c0_i32_0 : i32, i32, i32
  }
}

module attributes {stable_mosaic.version = 11 : i64} {
  func.func @_conv_act_kernel(%arg0: i32, %arg1: memref<1x8x512xbf16, #tpu.memory_space<vmem>>, %arg2: memref<9x16x8xbf16, #tpu.memory_space<vmem>>, %arg3: memref<16x1xf32, #tpu.memory_space<vmem>>, %arg4: memref<1x16x384xf32, #tpu.memory_space<vmem>>) attributes {dimension_semantics = [#tpu.dimension_semantics<parallel>], iteration_bounds = array<i64: 2>, scalar_prefetch = 0 : i64, scratch_operands = 0 : i64, tpu.core_type = #tpu.core_type<tc>, window_params = [{transform_indices = @transform_0, window_bounds = array<i64: 1, 8, 512>}, {pipeline_mode = #tpu.pipeline_mode<synchronous>, transform_indices = @transform_1, window_bounds = array<i64: 9, 16, 8>}, {pipeline_mode = #tpu.pipeline_mode<synchronous>, transform_indices = @transform_2, window_bounds = array<i64: 16, 1>}, {transform_indices = @transform_3, window_bounds = array<i64: 1, 16, 384>}]} {
    %cst = arith.constant 0.000000e+00 : f32
    %0 = vector.broadcast %cst : f32 to vector<16x384xf32>
    %c0 = arith.constant 0 : index
    %c0_0 = arith.constant 0 : index
    %c0_1 = arith.constant 0 : index
    %1 = vector.load %arg2[%c0, %c0_0, %c0_1] : memref<9x16x8xbf16, #tpu.memory_space<vmem>>, vector<1x16x8xbf16>
    %2 = vector.shape_cast %1 : vector<1x16x8xbf16> to vector<16x8xbf16>
    %c0_2 = arith.constant 0 : index
    %c0_3 = arith.constant 0 : index
    %c0_4 = arith.constant 0 : index
    %3 = vector.load %arg1[%c0_2, %c0_3, %c0_4] : memref<1x8x512xbf16, #tpu.memory_space<vmem>>, vector<1x8x384xbf16>
    %4 = vector.shape_cast %3 : vector<1x8x384xbf16> to vector<8x384xbf16>
    %cst_5 = arith.constant dense<0.000000e+00> : vector<16x384xf32>
    %5 = tpu.matmul %2, %4, %cst_5 {dimension_numbers = #tpu.dot_dimension_numbers<[1], [0], [0], [1], [0, 0, 1, 1], [], []>} : vector<16x8xbf16>, vector<8x384xbf16>, vector<16x384xf32> -> vector<16x384xf32>
    %6 = arith.addf %0, %5 : vector<16x384xf32>
    %c1 = arith.constant 1 : index
    %c0_6 = arith.constant 0 : index
    %c0_7 = arith.constant 0 : index
    %7 = vector.load %arg2[%c1, %c0_6, %c0_7] : memref<9x16x8xbf16, #tpu.memory_space<vmem>>, vector<1x16x8xbf16>
    %8 = vector.shape_cast %7 : vector<1x16x8xbf16> to vector<16x8xbf16>
    %c0_8 = arith.constant 0 : index
    %c0_9 = arith.constant 0 : index
    %c1_10 = arith.constant 1 : index
    %9 = vector.load %arg1[%c0_8, %c0_9, %c1_10] : memref<1x8x512xbf16, #tpu.memory_space<vmem>>, vector<1x8x384xbf16>
    %10 = vector.shape_cast %9 : vector<1x8x384xbf16> to vector<8x384xbf16>
    %cst_11 = arith.constant dense<0.000000e+00> : vector<16x384xf32>
    %11 = tpu.matmul %8, %10, %cst_11 {dimension_numbers = #tpu.dot_dimension_numbers<[1], [0], [0], [1], [0, 0, 1, 1], [], []>} : vector<16x8xbf16>, vector<8x384xbf16>, vector<16x384xf32> -> vector<16x384xf32>
    %12 = arith.addf %6, %11 : vector<16x384xf32>
    %c2 = arith.constant 2 : index
    %c0_12 = arith.constant 0 : index
    %c0_13 = arith.constant 0 : index
    %13 = vector.load %arg2[%c2, %c0_12, %c0_13] : memref<9x16x8xbf16, #tpu.memory_space<vmem>>, vector<1x16x8xbf16>
    %14 = vector.shape_cast %13 : vector<1x16x8xbf16> to vector<16x8xbf16>
    %c0_14 = arith.constant 0 : index
    %c0_15 = arith.constant 0 : index
    %c2_16 = arith.constant 2 : index
    %15 = vector.load %arg1[%c0_14, %c0_15, %c2_16] : memref<1x8x512xbf16, #tpu.memory_space<vmem>>, vector<1x8x384xbf16>
    %16 = vector.shape_cast %15 : vector<1x8x384xbf16> to vector<8x384xbf16>
    %cst_17 = arith.constant dense<0.000000e+00> : vector<16x384xf32>
    %17 = tpu.matmul %14, %16, %cst_17 {dimension_numbers = #tpu.dot_dimension_numbers<[1], [0], [0], [1], [0, 0, 1, 1], [], []>} : vector<16x8xbf16>, vector<8x384xbf16>, vector<16x384xf32> -> vector<16x384xf32>
    %18 = arith.addf %12, %17 : vector<16x384xf32>
    %c3 = arith.constant 3 : index
    %c0_18 = arith.constant 0 : index
    %c0_19 = arith.constant 0 : index
    %19 = vector.load %arg2[%c3, %c0_18, %c0_19] : memref<9x16x8xbf16, #tpu.memory_space<vmem>>, vector<1x16x8xbf16>
    %20 = vector.shape_cast %19 : vector<1x16x8xbf16> to vector<16x8xbf16>
    %c0_20 = arith.constant 0 : index
    %c0_21 = arith.constant 0 : index
    %c18 = arith.constant 18 : index
    %21 = vector.load %arg1[%c0_20, %c0_21, %c18] : memref<1x8x512xbf16, #tpu.memory_space<vmem>>, vector<1x8x384xbf16>
    %22 = vector.shape_cast %21 : vector<1x8x384xbf16> to vector<8x384xbf16>
    %cst_22 = arith.constant dense<0.000000e+00> : vector<16x384xf32>
    %23 = tpu.matmul %20, %22, %cst_22 {dimension_numbers = #tpu.dot_dimension_numbers<[1], [0], [0], [1], [0, 0, 1, 1], [], []>} : vector<16x8xbf16>, vector<8x384xbf16>, vector<16x384xf32> -> vector<16x384xf32>
    %24 = arith.addf %18, %23 : vector<16x384xf32>
    %c4 = arith.constant 4 : index
    %c0_23 = arith.constant 0 : index
    %c0_24 = arith.constant 0 : index
    %25 = vector.load %arg2[%c4, %c0_23, %c0_24] : memref<9x16x8xbf16, #tpu.memory_space<vmem>>, vector<1x16x8xbf16>
    %26 = vector.shape_cast %25 : vector<1x16x8xbf16> to vector<16x8xbf16>
    %c0_25 = arith.constant 0 : index
    %c0_26 = arith.constant 0 : index
    %c19 = arith.constant 19 : index
    %27 = vector.load %arg1[%c0_25, %c0_26, %c19] : memref<1x8x512xbf16, #tpu.memory_space<vmem>>, vector<1x8x384xbf16>
    %28 = vector.shape_cast %27 : vector<1x8x384xbf16> to vector<8x384xbf16>
    %cst_27 = arith.constant dense<0.000000e+00> : vector<16x384xf32>
    %29 = tpu.matmul %26, %28, %cst_27 {dimension_numbers = #tpu.dot_dimension_numbers<[1], [0], [0], [1], [0, 0, 1, 1], [], []>} : vector<16x8xbf16>, vector<8x384xbf16>, vector<16x384xf32> -> vector<16x384xf32>
    %30 = arith.addf %24, %29 : vector<16x384xf32>
    %c5 = arith.constant 5 : index
    %c0_28 = arith.constant 0 : index
    %c0_29 = arith.constant 0 : index
    %31 = vector.load %arg2[%c5, %c0_28, %c0_29] : memref<9x16x8xbf16, #tpu.memory_space<vmem>>, vector<1x16x8xbf16>
    %32 = vector.shape_cast %31 : vector<1x16x8xbf16> to vector<16x8xbf16>
    %c0_30 = arith.constant 0 : index
    %c0_31 = arith.constant 0 : index
    %c20 = arith.constant 20 : index
    %33 = vector.load %arg1[%c0_30, %c0_31, %c20] : memref<1x8x512xbf16, #tpu.memory_space<vmem>>, vector<1x8x384xbf16>
    %34 = vector.shape_cast %33 : vector<1x8x384xbf16> to vector<8x384xbf16>
    %cst_32 = arith.constant dense<0.000000e+00> : vector<16x384xf32>
    %35 = tpu.matmul %32, %34, %cst_32 {dimension_numbers = #tpu.dot_dimension_numbers<[1], [0], [0], [1], [0, 0, 1, 1], [], []>} : vector<16x8xbf16>, vector<8x384xbf16>, vector<16x384xf32> -> vector<16x384xf32>
    %36 = arith.addf %30, %35 : vector<16x384xf32>
    %c6 = arith.constant 6 : index
    %c0_33 = arith.constant 0 : index
    %c0_34 = arith.constant 0 : index
    %37 = vector.load %arg2[%c6, %c0_33, %c0_34] : memref<9x16x8xbf16, #tpu.memory_space<vmem>>, vector<1x16x8xbf16>
    %38 = vector.shape_cast %37 : vector<1x16x8xbf16> to vector<16x8xbf16>
    %c0_35 = arith.constant 0 : index
    %c0_36 = arith.constant 0 : index
    %c36 = arith.constant 36 : index
    %39 = vector.load %arg1[%c0_35, %c0_36, %c36] : memref<1x8x512xbf16, #tpu.memory_space<vmem>>, vector<1x8x384xbf16>
    %40 = vector.shape_cast %39 : vector<1x8x384xbf16> to vector<8x384xbf16>
    %cst_37 = arith.constant dense<0.000000e+00> : vector<16x384xf32>
    %41 = tpu.matmul %38, %40, %cst_37 {dimension_numbers = #tpu.dot_dimension_numbers<[1], [0], [0], [1], [0, 0, 1, 1], [], []>} : vector<16x8xbf16>, vector<8x384xbf16>, vector<16x384xf32> -> vector<16x384xf32>
    %42 = arith.addf %36, %41 : vector<16x384xf32>
    %c7 = arith.constant 7 : index
    %c0_38 = arith.constant 0 : index
    %c0_39 = arith.constant 0 : index
    %43 = vector.load %arg2[%c7, %c0_38, %c0_39] : memref<9x16x8xbf16, #tpu.memory_space<vmem>>, vector<1x16x8xbf16>
    %44 = vector.shape_cast %43 : vector<1x16x8xbf16> to vector<16x8xbf16>
    %c0_40 = arith.constant 0 : index
    %c0_41 = arith.constant 0 : index
    %c37 = arith.constant 37 : index
    %45 = vector.load %arg1[%c0_40, %c0_41, %c37] : memref<1x8x512xbf16, #tpu.memory_space<vmem>>, vector<1x8x384xbf16>
    %46 = vector.shape_cast %45 : vector<1x8x384xbf16> to vector<8x384xbf16>
    %cst_42 = arith.constant dense<0.000000e+00> : vector<16x384xf32>
    %47 = tpu.matmul %44, %46, %cst_42 {dimension_numbers = #tpu.dot_dimension_numbers<[1], [0], [0], [1], [0, 0, 1, 1], [], []>} : vector<16x8xbf16>, vector<8x384xbf16>, vector<16x384xf32> -> vector<16x384xf32>
    %48 = arith.addf %42, %47 : vector<16x384xf32>
    %c8 = arith.constant 8 : index
    %c0_43 = arith.constant 0 : index
    %c0_44 = arith.constant 0 : index
    %49 = vector.load %arg2[%c8, %c0_43, %c0_44] : memref<9x16x8xbf16, #tpu.memory_space<vmem>>, vector<1x16x8xbf16>
    %50 = vector.shape_cast %49 : vector<1x16x8xbf16> to vector<16x8xbf16>
    %c0_45 = arith.constant 0 : index
    %c0_46 = arith.constant 0 : index
    %c38 = arith.constant 38 : index
    %51 = vector.load %arg1[%c0_45, %c0_46, %c38] : memref<1x8x512xbf16, #tpu.memory_space<vmem>>, vector<1x8x384xbf16>
    %52 = vector.shape_cast %51 : vector<1x8x384xbf16> to vector<8x384xbf16>
    %cst_47 = arith.constant dense<0.000000e+00> : vector<16x384xf32>
    %53 = tpu.matmul %50, %52, %cst_47 {dimension_numbers = #tpu.dot_dimension_numbers<[1], [0], [0], [1], [0, 0, 1, 1], [], []>} : vector<16x8xbf16>, vector<8x384xbf16>, vector<16x384xf32> -> vector<16x384xf32>
    %54 = arith.addf %48, %53 : vector<16x384xf32>
    %c0_48 = arith.constant 0 : index
    %c0_49 = arith.constant 0 : index
    %55 = vector.load %arg3[%c0_48, %c0_49] : memref<16x1xf32, #tpu.memory_space<vmem>>, vector<16x1xf32>
    %56 = vector.broadcast %55 : vector<16x1xf32> to vector<16x384xf32>
    %57 = arith.addf %54, %56 : vector<16x384xf32>
    %cst_50 = arith.constant 0.000000e+00 : f32
    %58 = vector.broadcast %cst_50 : f32 to vector<16x384xf32>
    %59 = arith.cmpf ogt, %57, %58 : vector<16x384xf32>
    %cst_51 = arith.constant 2.000000e-01 : f32
    %60 = vector.broadcast %cst_51 : f32 to vector<16x384xf32>
    %61 = arith.mulf %60, %57 : vector<16x384xf32>
    %62 = arith.select %59, %57, %61 : vector<16x384xi1>, vector<16x384xf32>
    %c0_52 = arith.constant 0 : index
    %c0_53 = arith.constant 0 : index
    %c0_54 = arith.constant 0 : index
    %63 = vector.load %arg4[%c0_52, %c0_53, %c0_54] : memref<1x16x384xf32, #tpu.memory_space<vmem>>, vector<1x16x384xf32>
    %64 = vector.shape_cast %63 : vector<1x16x384xf32> to vector<16x384xf32>
    %65 = vector.shape_cast %62 : vector<16x384xf32> to vector<1x16x384xf32>
    tpu.vector_store %arg4[%c0_52, %c0_53, %c0_54], %65 {strides = array<i32>} : memref<1x16x384xf32, #tpu.memory_space<vmem>>, vector<1x16x384xf32>,
    return
  }
  func.func @transform_0(%arg0: i32) -> (i32, i32, i32) {
    %c0_i32 = arith.constant 0 : i32
    %c0_i32_0 = arith.constant 0 : i32
    %c0_i32_1 = arith.constant 0 : i32
    return %arg0, %c0_i32, %c0_i32_0 : i32, i32, i32
  }
  func.func @transform_1(%arg0: i32) -> (i32, i32, i32) {
    %c0_i32 = arith.constant 0 : i32
    %c0_i32_0 = arith.constant 0 : i32
    %c0_i32_1 = arith.constant 0 : i32
    %c0_i32_2 = arith.constant 0 : i32
    return %c0_i32, %c0_i32_0, %c0_i32_1 : i32, i32, i32
  }
  func.func @transform_2(%arg0: i32) -> (i32, i32) {
    %c0_i32 = arith.constant 0 : i32
    %c0_i32_0 = arith.constant 0 : i32
    %c0_i32_1 = arith.constant 0 : i32
    return %c0_i32, %c0_i32_0 : i32, i32
  }
  func.func @transform_3(%arg0: i32) -> (i32, i32, i32) {
    %c0_i32 = arith.constant 0 : i32
    %c0_i32_0 = arith.constant 0 : i32
    %c0_i32_1 = arith.constant 0 : i32
    return %arg0, %c0_i32, %c0_i32_0 : i32, i32, i32
  }
}

module attributes {stable_mosaic.version = 11 : i64} {
  func.func @_resblock_kernel(%arg0: i32, %arg1: memref<1x16x256xbf16, #tpu.memory_space<vmem>>, %arg2: memref<1x256xi32, #tpu.memory_space<vmem>>, %arg3: memref<9x16x16xbf16, #tpu.memory_space<vmem>>, %arg4: memref<16x1xf32, #tpu.memory_space<vmem>>, %arg5: memref<9x16x16xbf16, #tpu.memory_space<vmem>>, %arg6: memref<16x1xf32, #tpu.memory_space<vmem>>, %arg7: memref<1x16x128xf32, #tpu.memory_space<vmem>>, %arg8: memref<16x256xbf16, #tpu.memory_space<vmem>>) attributes {dimension_semantics = [#tpu.dimension_semantics<parallel>], iteration_bounds = array<i64: 2>, scalar_prefetch = 0 : i64, scratch_operands = 1 : i64, tpu.core_type = #tpu.core_type<tc>, window_params = [{transform_indices = @transform_0, window_bounds = array<i64: 1, 16, 256>}, {pipeline_mode = #tpu.pipeline_mode<synchronous>, transform_indices = @transform_1, window_bounds = array<i64: 1, 256>}, {pipeline_mode = #tpu.pipeline_mode<synchronous>, transform_indices = @transform_2, window_bounds = array<i64: 9, 16, 16>}, {pipeline_mode = #tpu.pipeline_mode<synchronous>, transform_indices = @transform_3, window_bounds = array<i64: 16, 1>}, {pipeline_mode = #tpu.pipeline_mode<synchronous>, transform_indices = @transform_4, window_bounds = array<i64: 9, 16, 16>}, {pipeline_mode = #tpu.pipeline_mode<synchronous>, transform_indices = @transform_5, window_bounds = array<i64: 16, 1>}, {transform_indices = @transform_6, window_bounds = array<i64: 1, 16, 128>}]} {
    %cst = arith.constant 0.000000e+00 : f32
    %0 = vector.broadcast %cst : f32 to vector<16x128xf32>
    %c0 = arith.constant 0 : index
    %c0_0 = arith.constant 0 : index
    %c0_1 = arith.constant 0 : index
    %1 = vector.load %arg3[%c0, %c0_0, %c0_1] : memref<9x16x16xbf16, #tpu.memory_space<vmem>>, vector<1x16x16xbf16>
    %2 = vector.shape_cast %1 : vector<1x16x16xbf16> to vector<16x16xbf16>
    %c0_2 = arith.constant 0 : index
    %c0_3 = arith.constant 0 : index
    %c0_4 = arith.constant 0 : index
    %3 = vector.load %arg1[%c0_2, %c0_3, %c0_4] : memref<1x16x256xbf16, #tpu.memory_space<vmem>>, vector<1x16x128xbf16>
    %4 = vector.shape_cast %3 : vector<1x16x128xbf16> to vector<16x128xbf16>
    %cst_5 = arith.constant dense<0.000000e+00> : vector<16x128xf32>
    %5 = tpu.matmul %2, %4, %cst_5 {dimension_numbers = #tpu.dot_dimension_numbers<[1], [0], [0], [1], [0, 0, 1, 1], [], []>} : vector<16x16xbf16>, vector<16x128xbf16>, vector<16x128xf32> -> vector<16x128xf32>
    %6 = arith.addf %0, %5 : vector<16x128xf32>
    %c1 = arith.constant 1 : index
    %c0_6 = arith.constant 0 : index
    %c0_7 = arith.constant 0 : index
    %7 = vector.load %arg3[%c1, %c0_6, %c0_7] : memref<9x16x16xbf16, #tpu.memory_space<vmem>>, vector<1x16x16xbf16>
    %8 = vector.shape_cast %7 : vector<1x16x16xbf16> to vector<16x16xbf16>
    %c0_8 = arith.constant 0 : index
    %c0_9 = arith.constant 0 : index
    %c1_10 = arith.constant 1 : index
    %9 = vector.load %arg1[%c0_8, %c0_9, %c1_10] : memref<1x16x256xbf16, #tpu.memory_space<vmem>>, vector<1x16x128xbf16>
    %10 = vector.shape_cast %9 : vector<1x16x128xbf16> to vector<16x128xbf16>
    %cst_11 = arith.constant dense<0.000000e+00> : vector<16x128xf32>
    %11 = tpu.matmul %8, %10, %cst_11 {dimension_numbers = #tpu.dot_dimension_numbers<[1], [0], [0], [1], [0, 0, 1, 1], [], []>} : vector<16x16xbf16>, vector<16x128xbf16>, vector<16x128xf32> -> vector<16x128xf32>
    %12 = arith.addf %6, %11 : vector<16x128xf32>
    %c2 = arith.constant 2 : index
    %c0_12 = arith.constant 0 : index
    %c0_13 = arith.constant 0 : index
    %13 = vector.load %arg3[%c2, %c0_12, %c0_13] : memref<9x16x16xbf16, #tpu.memory_space<vmem>>, vector<1x16x16xbf16>
    %14 = vector.shape_cast %13 : vector<1x16x16xbf16> to vector<16x16xbf16>
    %c0_14 = arith.constant 0 : index
    %c0_15 = arith.constant 0 : index
    %c2_16 = arith.constant 2 : index
    %15 = vector.load %arg1[%c0_14, %c0_15, %c2_16] : memref<1x16x256xbf16, #tpu.memory_space<vmem>>, vector<1x16x128xbf16>
    %16 = vector.shape_cast %15 : vector<1x16x128xbf16> to vector<16x128xbf16>
    %cst_17 = arith.constant dense<0.000000e+00> : vector<16x128xf32>
    %17 = tpu.matmul %14, %16, %cst_17 {dimension_numbers = #tpu.dot_dimension_numbers<[1], [0], [0], [1], [0, 0, 1, 1], [], []>} : vector<16x16xbf16>, vector<16x128xbf16>, vector<16x128xf32> -> vector<16x128xf32>
    %18 = arith.addf %12, %17 : vector<16x128xf32>
    %c3 = arith.constant 3 : index
    %c0_18 = arith.constant 0 : index
    %c0_19 = arith.constant 0 : index
    %19 = vector.load %arg3[%c3, %c0_18, %c0_19] : memref<9x16x16xbf16, #tpu.memory_space<vmem>>, vector<1x16x16xbf16>
    %20 = vector.shape_cast %19 : vector<1x16x16xbf16> to vector<16x16xbf16>
    %c0_20 = arith.constant 0 : index
    %c0_21 = arith.constant 0 : index
    %c10 = arith.constant 10 : index
    %21 = vector.load %arg1[%c0_20, %c0_21, %c10] : memref<1x16x256xbf16, #tpu.memory_space<vmem>>, vector<1x16x128xbf16>
    %22 = vector.shape_cast %21 : vector<1x16x128xbf16> to vector<16x128xbf16>
    %cst_22 = arith.constant dense<0.000000e+00> : vector<16x128xf32>
    %23 = tpu.matmul %20, %22, %cst_22 {dimension_numbers = #tpu.dot_dimension_numbers<[1], [0], [0], [1], [0, 0, 1, 1], [], []>} : vector<16x16xbf16>, vector<16x128xbf16>, vector<16x128xf32> -> vector<16x128xf32>
    %24 = arith.addf %18, %23 : vector<16x128xf32>
    %c4 = arith.constant 4 : index
    %c0_23 = arith.constant 0 : index
    %c0_24 = arith.constant 0 : index
    %25 = vector.load %arg3[%c4, %c0_23, %c0_24] : memref<9x16x16xbf16, #tpu.memory_space<vmem>>, vector<1x16x16xbf16>
    %26 = vector.shape_cast %25 : vector<1x16x16xbf16> to vector<16x16xbf16>
    %c0_25 = arith.constant 0 : index
    %c0_26 = arith.constant 0 : index
    %c11 = arith.constant 11 : index
    %27 = vector.load %arg1[%c0_25, %c0_26, %c11] : memref<1x16x256xbf16, #tpu.memory_space<vmem>>, vector<1x16x128xbf16>
    %28 = vector.shape_cast %27 : vector<1x16x128xbf16> to vector<16x128xbf16>
    %cst_27 = arith.constant dense<0.000000e+00> : vector<16x128xf32>
    %29 = tpu.matmul %26, %28, %cst_27 {dimension_numbers = #tpu.dot_dimension_numbers<[1], [0], [0], [1], [0, 0, 1, 1], [], []>} : vector<16x16xbf16>, vector<16x128xbf16>, vector<16x128xf32> -> vector<16x128xf32>
    %30 = arith.addf %24, %29 : vector<16x128xf32>
    %c5 = arith.constant 5 : index
    %c0_28 = arith.constant 0 : index
    %c0_29 = arith.constant 0 : index
    %31 = vector.load %arg3[%c5, %c0_28, %c0_29] : memref<9x16x16xbf16, #tpu.memory_space<vmem>>, vector<1x16x16xbf16>
    %32 = vector.shape_cast %31 : vector<1x16x16xbf16> to vector<16x16xbf16>
    %c0_30 = arith.constant 0 : index
    %c0_31 = arith.constant 0 : index
    %c12 = arith.constant 12 : index
    %33 = vector.load %arg1[%c0_30, %c0_31, %c12] : memref<1x16x256xbf16, #tpu.memory_space<vmem>>, vector<1x16x128xbf16>
    %34 = vector.shape_cast %33 : vector<1x16x128xbf16> to vector<16x128xbf16>
    %cst_32 = arith.constant dense<0.000000e+00> : vector<16x128xf32>
    %35 = tpu.matmul %32, %34, %cst_32 {dimension_numbers = #tpu.dot_dimension_numbers<[1], [0], [0], [1], [0, 0, 1, 1], [], []>} : vector<16x16xbf16>, vector<16x128xbf16>, vector<16x128xf32> -> vector<16x128xf32>
    %36 = arith.addf %30, %35 : vector<16x128xf32>
    %c6 = arith.constant 6 : index
    %c0_33 = arith.constant 0 : index
    %c0_34 = arith.constant 0 : index
    %37 = vector.load %arg3[%c6, %c0_33, %c0_34] : memref<9x16x16xbf16, #tpu.memory_space<vmem>>, vector<1x16x16xbf16>
    %38 = vector.shape_cast %37 : vector<1x16x16xbf16> to vector<16x16xbf16>
    %c0_35 = arith.constant 0 : index
    %c0_36 = arith.constant 0 : index
    %c20 = arith.constant 20 : index
    %39 = vector.load %arg1[%c0_35, %c0_36, %c20] : memref<1x16x256xbf16, #tpu.memory_space<vmem>>, vector<1x16x128xbf16>
    %40 = vector.shape_cast %39 : vector<1x16x128xbf16> to vector<16x128xbf16>
    %cst_37 = arith.constant dense<0.000000e+00> : vector<16x128xf32>
    %41 = tpu.matmul %38, %40, %cst_37 {dimension_numbers = #tpu.dot_dimension_numbers<[1], [0], [0], [1], [0, 0, 1, 1], [], []>} : vector<16x16xbf16>, vector<16x128xbf16>, vector<16x128xf32> -> vector<16x128xf32>
    %42 = arith.addf %36, %41 : vector<16x128xf32>
    %c7 = arith.constant 7 : index
    %c0_38 = arith.constant 0 : index
    %c0_39 = arith.constant 0 : index
    %43 = vector.load %arg3[%c7, %c0_38, %c0_39] : memref<9x16x16xbf16, #tpu.memory_space<vmem>>, vector<1x16x16xbf16>
    %44 = vector.shape_cast %43 : vector<1x16x16xbf16> to vector<16x16xbf16>
    %c0_40 = arith.constant 0 : index
    %c0_41 = arith.constant 0 : index
    %c21 = arith.constant 21 : index
    %45 = vector.load %arg1[%c0_40, %c0_41, %c21] : memref<1x16x256xbf16, #tpu.memory_space<vmem>>, vector<1x16x128xbf16>
    %46 = vector.shape_cast %45 : vector<1x16x128xbf16> to vector<16x128xbf16>
    %cst_42 = arith.constant dense<0.000000e+00> : vector<16x128xf32>
    %47 = tpu.matmul %44, %46, %cst_42 {dimension_numbers = #tpu.dot_dimension_numbers<[1], [0], [0], [1], [0, 0, 1, 1], [], []>} : vector<16x16xbf16>, vector<16x128xbf16>, vector<16x128xf32> -> vector<16x128xf32>
    %48 = arith.addf %42, %47 : vector<16x128xf32>
    %c8 = arith.constant 8 : index
    %c0_43 = arith.constant 0 : index
    %c0_44 = arith.constant 0 : index
    %49 = vector.load %arg3[%c8, %c0_43, %c0_44] : memref<9x16x16xbf16, #tpu.memory_space<vmem>>, vector<1x16x16xbf16>
    %50 = vector.shape_cast %49 : vector<1x16x16xbf16> to vector<16x16xbf16>
    %c0_45 = arith.constant 0 : index
    %c0_46 = arith.constant 0 : index
    %c22 = arith.constant 22 : index
    %51 = vector.load %arg1[%c0_45, %c0_46, %c22] : memref<1x16x256xbf16, #tpu.memory_space<vmem>>, vector<1x16x128xbf16>
    %52 = vector.shape_cast %51 : vector<1x16x128xbf16> to vector<16x128xbf16>
    %cst_47 = arith.constant dense<0.000000e+00> : vector<16x128xf32>
    %53 = tpu.matmul %50, %52, %cst_47 {dimension_numbers = #tpu.dot_dimension_numbers<[1], [0], [0], [1], [0, 0, 1, 1], [], []>} : vector<16x16xbf16>, vector<16x128xbf16>, vector<16x128xf32> -> vector<16x128xf32>
    %54 = arith.addf %48, %53 : vector<16x128xf32>
    %c0_48 = arith.constant 0 : index
    %c0_49 = arith.constant 0 : index
    %55 = vector.load %arg4[%c0_48, %c0_49] : memref<16x1xf32, #tpu.memory_space<vmem>>, vector<16x1xf32>
    %56 = vector.broadcast %55 : vector<16x1xf32> to vector<16x128xf32>
    %57 = arith.addf %54, %56 : vector<16x128xf32>
    %cst_50 = arith.constant 0.000000e+00 : f32
    %58 = vector.broadcast %cst_50 : f32 to vector<16x128xf32>
    %59 = arith.maximumf %57, %58 : vector<16x128xf32>
    %cst_51 = arith.constant 0.000000e+00 : bf16
    %60 = vector.broadcast %cst_51 : bf16 to vector<16x256xbf16>
    %c0_52 = arith.constant 0 : index
    %c0_53 = arith.constant 0 : index
    %61 = vector.load %arg8[%c0_52, %c0_53] : memref<16x256xbf16, #tpu.memory_space<vmem>>, vector<16x256xbf16>
    tpu.vector_store %arg8[%c0_52, %c0_53], %60 {strides = array<i32>} : memref<16x256xbf16, #tpu.memory_space<vmem>>, vector<16x256xbf16>,
    %62 = arith.truncf %59 : vector<16x128xf32> to vector<16x128xbf16>
    %c0_54 = arith.constant 0 : index
    %c11_55 = arith.constant 11 : index
    %63 = vector.load %arg8[%c0_54, %c11_55] : memref<16x256xbf16, #tpu.memory_space<vmem>>, vector<16x128xbf16>
    tpu.vector_store %arg8[%c0_54, %c11_55], %62 {strides = array<i32>} : memref<16x256xbf16, #tpu.memory_space<vmem>>, vector<16x128xbf16>,
    %c0_56 = arith.constant 0 : index
    %c20_57 = arith.constant 20 : index
    %64 = vector.load %arg8[%c0_56, %c20_57] : memref<16x256xbf16, #tpu.memory_space<vmem>>, vector<16x10xbf16>
    %c0_58 = arith.constant 0 : index
    %c0_59 = arith.constant 0 : index
    %65 = vector.load %arg8[%c0_58, %c0_59] : memref<16x256xbf16, #tpu.memory_space<vmem>>, vector<16x10xbf16>
    tpu.vector_store %arg8[%c0_58, %c0_59], %64 {strides = array<i32>} : memref<16x256xbf16, #tpu.memory_space<vmem>>, vector<16x10xbf16>,
    %c0_60 = arith.constant 0 : index
    %c70 = arith.constant 70 : index
    %66 = vector.load %arg8[%c0_60, %c70] : memref<16x256xbf16, #tpu.memory_space<vmem>>, vector<16x10xbf16>
    %c0_61 = arith.constant 0 : index
    %c90 = arith.constant 90 : index
    %67 = vector.load %arg8[%c0_61, %c90] : memref<16x256xbf16, #tpu.memory_space<vmem>>, vector<16x10xbf16>
    tpu.vector_store %arg8[%c0_61, %c90], %66 {strides = array<i32>} : memref<16x256xbf16, #tpu.memory_space<vmem>>, vector<16x10xbf16>,
    %c0_62 = arith.constant 0 : index
    %c0_63 = arith.constant 0 : index
    %68 = vector.load %arg8[%c0_62, %c0_63] : memref<16x256xbf16, #tpu.memory_space<vmem>>, vector<16x254xbf16>
    %c0_64 = arith.constant 0 : index
    %c2_65 = arith.constant 2 : index
    %69 = vector.load %arg8[%c0_64, %c2_65] : memref<16x256xbf16, #tpu.memory_space<vmem>>, vector<16x254xbf16>
    %c0_66 = arith.constant 0 : index
    %c0_67 = arith.constant 0 : index
    %70 = vector.load %arg2[%c0_66, %c0_67] : memref<1x256xi32, #tpu.memory_space<vmem>>, vector<1x254xi32>
    %c0_i32 = arith.constant 0 : i32
    %71 = vector.broadcast %c0_i32 : i32 to vector<1x254xi32>
    %72 = arith.cmpi eq, %70, %71 : vector<1x254xi32>
    %73 = vector.shape_cast %72 : vector<1x254xi1> to vector<1x254xi1>
    %74 = vector.broadcast %73 : vector<1x254xi1> to vector<16x254xi1>
    %75 = arith.select %74, %69, %68 : vector<16x254xi1>, vector<16x254xbf16>
    %c0_68 = arith.constant 0 : index
    %c0_69 = arith.constant 0 : index
    %76 = vector.load %arg8[%c0_68, %c0_69] : memref<16x256xbf16, #tpu.memory_space<vmem>>, vector<16x254xbf16>
    tpu.vector_store %arg8[%c0_68, %c0_69], %75 {strides = array<i32>} : memref<16x256xbf16, #tpu.memory_space<vmem>>, vector<16x254xbf16>,
    %c0_70 = arith.constant 0 : index
    %c2_71 = arith.constant 2 : index
    %77 = vector.load %arg8[%c0_70, %c2_71] : memref<16x256xbf16, #tpu.memory_space<vmem>>, vector<16x254xbf16>
    %c0_72 = arith.constant 0 : index
    %c0_73 = arith.constant 0 : index
    %78 = vector.load %arg8[%c0_72, %c0_73] : memref<16x256xbf16, #tpu.memory_space<vmem>>, vector<16x254xbf16>
    %c0_74 = arith.constant 0 : index
    %c2_75 = arith.constant 2 : index
    %79 = vector.load %arg2[%c0_74, %c2_75] : memref<1x256xi32, #tpu.memory_space<vmem>>, vector<1x254xi32>
    %c9_i32 = arith.constant 9 : i32
    %80 = vector.broadcast %c9_i32 : i32 to vector<1x254xi32>
    %81 = arith.cmpi eq, %79, %80 : vector<1x254xi32>
    %82 = vector.shape_cast %81 : vector<1x254xi1> to vector<1x254xi1>
    %83 = vector.broadcast %82 : vector<1x254xi1> to vector<16x254xi1>
    %84 = arith.select %83, %78, %77 : vector<16x254xi1>, vector<16x254xbf16>
    %c0_76 = arith.constant 0 : index
    %c2_77 = arith.constant 2 : index
    %85 = vector.load %arg8[%c0_76, %c2_77] : memref<16x256xbf16, #tpu.memory_space<vmem>>, vector<16x254xbf16>
    tpu.vector_store %arg8[%c0_76, %c2_77], %84 {strides = array<i32>} : memref<16x256xbf16, #tpu.memory_space<vmem>>, vector<16x254xbf16>,
    %cst_78 = arith.constant 0.000000e+00 : f32
    %86 = vector.broadcast %cst_78 : f32 to vector<16x128xf32>
    %c0_79 = arith.constant 0 : index
    %c0_80 = arith.constant 0 : index
    %c0_81 = arith.constant 0 : index
    %87 = vector.load %arg5[%c0_79, %c0_80, %c0_81] : memref<9x16x16xbf16, #tpu.memory_space<vmem>>, vector<1x16x16xbf16>
    %88 = vector.shape_cast %87 : vector<1x16x16xbf16> to vector<16x16xbf16>
    %c0_82 = arith.constant 0 : index
    %c0_83 = arith.constant 0 : index
    %89 = vector.load %arg8[%c0_82, %c0_83] : memref<16x256xbf16, #tpu.memory_space<vmem>>, vector<16x128xbf16>
    %cst_84 = arith.constant dense<0.000000e+00> : vector<16x128xf32>
    %90 = tpu.matmul %88, %89, %cst_84 {dimension_numbers = #tpu.dot_dimension_numbers<[1], [0], [0], [1], [0, 0, 1, 1], [], []>} : vector<16x16xbf16>, vector<16x128xbf16>, vector<16x128xf32> -> vector<16x128xf32>
    %91 = arith.addf %86, %90 : vector<16x128xf32>
    %c1_85 = arith.constant 1 : index
    %c0_86 = arith.constant 0 : index
    %c0_87 = arith.constant 0 : index
    %92 = vector.load %arg5[%c1_85, %c0_86, %c0_87] : memref<9x16x16xbf16, #tpu.memory_space<vmem>>, vector<1x16x16xbf16>
    %93 = vector.shape_cast %92 : vector<1x16x16xbf16> to vector<16x16xbf16>
    %c0_88 = arith.constant 0 : index
    %c1_89 = arith.constant 1 : index
    %94 = vector.load %arg8[%c0_88, %c1_89] : memref<16x256xbf16, #tpu.memory_space<vmem>>, vector<16x128xbf16>
    %cst_90 = arith.constant dense<0.000000e+00> : vector<16x128xf32>
    %95 = tpu.matmul %93, %94, %cst_90 {dimension_numbers = #tpu.dot_dimension_numbers<[1], [0], [0], [1], [0, 0, 1, 1], [], []>} : vector<16x16xbf16>, vector<16x128xbf16>, vector<16x128xf32> -> vector<16x128xf32>
    %96 = arith.addf %91, %95 : vector<16x128xf32>
    %c2_91 = arith.constant 2 : index
    %c0_92 = arith.constant 0 : index
    %c0_93 = arith.constant 0 : index
    %97 = vector.load %arg5[%c2_91, %c0_92, %c0_93] : memref<9x16x16xbf16, #tpu.memory_space<vmem>>, vector<1x16x16xbf16>
    %98 = vector.shape_cast %97 : vector<1x16x16xbf16> to vector<16x16xbf16>
    %c0_94 = arith.constant 0 : index
    %c2_95 = arith.constant 2 : index
    %99 = vector.load %arg8[%c0_94, %c2_95] : memref<16x256xbf16, #tpu.memory_space<vmem>>, vector<16x128xbf16>
    %cst_96 = arith.constant dense<0.000000e+00> : vector<16x128xf32>
    %100 = tpu.matmul %98, %99, %cst_96 {dimension_numbers = #tpu.dot_dimension_numbers<[1], [0], [0], [1], [0, 0, 1, 1], [], []>} : vector<16x16xbf16>, vector<16x128xbf16>, vector<16x128xf32> -> vector<16x128xf32>
    %101 = arith.addf %96, %100 : vector<16x128xf32>
    %c3_97 = arith.constant 3 : index
    %c0_98 = arith.constant 0 : index
    %c0_99 = arith.constant 0 : index
    %102 = vector.load %arg5[%c3_97, %c0_98, %c0_99] : memref<9x16x16xbf16, #tpu.memory_space<vmem>>, vector<1x16x16xbf16>
    %103 = vector.shape_cast %102 : vector<1x16x16xbf16> to vector<16x16xbf16>
    %c0_100 = arith.constant 0 : index
    %c10_101 = arith.constant 10 : index
    %104 = vector.load %arg8[%c0_100, %c10_101] : memref<16x256xbf16, #tpu.memory_space<vmem>>, vector<16x128xbf16>
    %cst_102 = arith.constant dense<0.000000e+00> : vector<16x128xf32>
    %105 = tpu.matmul %103, %104, %cst_102 {dimension_numbers = #tpu.dot_dimension_numbers<[1], [0], [0], [1], [0, 0, 1, 1], [], []>} : vector<16x16xbf16>, vector<16x128xbf16>, vector<16x128xf32> -> vector<16x128xf32>
    %106 = arith.addf %101, %105 : vector<16x128xf32>
    %c4_103 = arith.constant 4 : index
    %c0_104 = arith.constant 0 : index
    %c0_105 = arith.constant 0 : index
    %107 = vector.load %arg5[%c4_103, %c0_104, %c0_105] : memref<9x16x16xbf16, #tpu.memory_space<vmem>>, vector<1x16x16xbf16>
    %108 = vector.shape_cast %107 : vector<1x16x16xbf16> to vector<16x16xbf16>
    %c0_106 = arith.constant 0 : index
    %c11_107 = arith.constant 11 : index
    %109 = vector.load %arg8[%c0_106, %c11_107] : memref<16x256xbf16, #tpu.memory_space<vmem>>, vector<16x128xbf16>
    %cst_108 = arith.constant dense<0.000000e+00> : vector<16x128xf32>
    %110 = tpu.matmul %108, %109, %cst_108 {dimension_numbers = #tpu.dot_dimension_numbers<[1], [0], [0], [1], [0, 0, 1, 1], [], []>} : vector<16x16xbf16>, vector<16x128xbf16>, vector<16x128xf32> -> vector<16x128xf32>
    %111 = arith.addf %106, %110 : vector<16x128xf32>
    %c5_109 = arith.constant 5 : index
    %c0_110 = arith.constant 0 : index
    %c0_111 = arith.constant 0 : index
    %112 = vector.load %arg5[%c5_109, %c0_110, %c0_111] : memref<9x16x16xbf16, #tpu.memory_space<vmem>>, vector<1x16x16xbf16>
    %113 = vector.shape_cast %112 : vector<1x16x16xbf16> to vector<16x16xbf16>
    %c0_112 = arith.constant 0 : index
    %c12_113 = arith.constant 12 : index
    %114 = vector.load %arg8[%c0_112, %c12_113] : memref<16x256xbf16, #tpu.memory_space<vmem>>, vector<16x128xbf16>
    %cst_114 = arith.constant dense<0.000000e+00> : vector<16x128xf32>
    %115 = tpu.matmul %113, %114, %cst_114 {dimension_numbers = #tpu.dot_dimension_numbers<[1], [0], [0], [1], [0, 0, 1, 1], [], []>} : vector<16x16xbf16>, vector<16x128xbf16>, vector<16x128xf32> -> vector<16x128xf32>
    %116 = arith.addf %111, %115 : vector<16x128xf32>
    %c6_115 = arith.constant 6 : index
    %c0_116 = arith.constant 0 : index
    %c0_117 = arith.constant 0 : index
    %117 = vector.load %arg5[%c6_115, %c0_116, %c0_117] : memref<9x16x16xbf16, #tpu.memory_space<vmem>>, vector<1x16x16xbf16>
    %118 = vector.shape_cast %117 : vector<1x16x16xbf16> to vector<16x16xbf16>
    %c0_118 = arith.constant 0 : index
    %c20_119 = arith.constant 20 : index
    %119 = vector.load %arg8[%c0_118, %c20_119] : memref<16x256xbf16, #tpu.memory_space<vmem>>, vector<16x128xbf16>
    %cst_120 = arith.constant dense<0.000000e+00> : vector<16x128xf32>
    %120 = tpu.matmul %118, %119, %cst_120 {dimension_numbers = #tpu.dot_dimension_numbers<[1], [0], [0], [1], [0, 0, 1, 1], [], []>} : vector<16x16xbf16>, vector<16x128xbf16>, vector<16x128xf32> -> vector<16x128xf32>
    %121 = arith.addf %116, %120 : vector<16x128xf32>
    %c7_121 = arith.constant 7 : index
    %c0_122 = arith.constant 0 : index
    %c0_123 = arith.constant 0 : index
    %122 = vector.load %arg5[%c7_121, %c0_122, %c0_123] : memref<9x16x16xbf16, #tpu.memory_space<vmem>>, vector<1x16x16xbf16>
    %123 = vector.shape_cast %122 : vector<1x16x16xbf16> to vector<16x16xbf16>
    %c0_124 = arith.constant 0 : index
    %c21_125 = arith.constant 21 : index
    %124 = vector.load %arg8[%c0_124, %c21_125] : memref<16x256xbf16, #tpu.memory_space<vmem>>, vector<16x128xbf16>
    %cst_126 = arith.constant dense<0.000000e+00> : vector<16x128xf32>
    %125 = tpu.matmul %123, %124, %cst_126 {dimension_numbers = #tpu.dot_dimension_numbers<[1], [0], [0], [1], [0, 0, 1, 1], [], []>} : vector<16x16xbf16>, vector<16x128xbf16>, vector<16x128xf32> -> vector<16x128xf32>
    %126 = arith.addf %121, %125 : vector<16x128xf32>
    %c8_127 = arith.constant 8 : index
    %c0_128 = arith.constant 0 : index
    %c0_129 = arith.constant 0 : index
    %127 = vector.load %arg5[%c8_127, %c0_128, %c0_129] : memref<9x16x16xbf16, #tpu.memory_space<vmem>>, vector<1x16x16xbf16>
    %128 = vector.shape_cast %127 : vector<1x16x16xbf16> to vector<16x16xbf16>
    %c0_130 = arith.constant 0 : index
    %c22_131 = arith.constant 22 : index
    %129 = vector.load %arg8[%c0_130, %c22_131] : memref<16x256xbf16, #tpu.memory_space<vmem>>, vector<16x128xbf16>
    %cst_132 = arith.constant dense<0.000000e+00> : vector<16x128xf32>
    %130 = tpu.matmul %128, %129, %cst_132 {dimension_numbers = #tpu.dot_dimension_numbers<[1], [0], [0], [1], [0, 0, 1, 1], [], []>} : vector<16x16xbf16>, vector<16x128xbf16>, vector<16x128xf32> -> vector<16x128xf32>
    %131 = arith.addf %126, %130 : vector<16x128xf32>
    %c0_133 = arith.constant 0 : index
    %c0_134 = arith.constant 0 : index
    %132 = vector.load %arg6[%c0_133, %c0_134] : memref<16x1xf32, #tpu.memory_space<vmem>>, vector<16x1xf32>
    %133 = vector.broadcast %132 : vector<16x1xf32> to vector<16x128xf32>
    %134 = arith.addf %131, %133 : vector<16x128xf32>
    %c0_135 = arith.constant 0 : index
    %c0_136 = arith.constant 0 : index
    %c11_137 = arith.constant 11 : index
    %135 = vector.load %arg1[%c0_135, %c0_136, %c11_137] : memref<1x16x256xbf16, #tpu.memory_space<vmem>>, vector<1x16x128xbf16>
    %136 = vector.shape_cast %135 : vector<1x16x128xbf16> to vector<16x128xbf16>
    %137 = arith.extf %136 : vector<16x128xbf16> to vector<16x128xf32>
    %138 = arith.addf %134, %137 : vector<16x128xf32>
    %c0_138 = arith.constant 0 : index
    %c0_139 = arith.constant 0 : index
    %c0_140 = arith.constant 0 : index
    %139 = vector.load %arg7[%c0_138, %c0_139, %c0_140] : memref<1x16x128xf32, #tpu.memory_space<vmem>>, vector<1x16x128xf32>
    %140 = vector.shape_cast %139 : vector<1x16x128xf32> to vector<16x128xf32>
    %141 = vector.shape_cast %138 : vector<16x128xf32> to vector<1x16x128xf32>
    tpu.vector_store %arg7[%c0_138, %c0_139, %c0_140], %141 {strides = array<i32>} : memref<1x16x128xf32, #tpu.memory_space<vmem>>, vector<1x16x128xf32>,
    return
  }
  func.func @transform_0(%arg0: i32) -> (i32, i32, i32) {
    %c0_i32 = arith.constant 0 : i32
    %c0_i32_0 = arith.constant 0 : i32
    %c0_i32_1 = arith.constant 0 : i32
    return %arg0, %c0_i32, %c0_i32_0 : i32, i32, i32
  }
  func.func @transform_1(%arg0: i32) -> (i32, i32) {
    %c0_i32 = arith.constant 0 : i32
    %c0_i32_0 = arith.constant 0 : i32
    %c0_i32_1 = arith.constant 0 : i32
    return %c0_i32, %c0_i32_0 : i32, i32
  }
  func.func @transform_2(%arg0: i32) -> (i32, i32, i32) {
    %c0_i32 = arith.constant 0 : i32
    %c0_i32_0 = arith.constant 0 : i32
    %c0_i32_1 = arith.constant 0 : i32
    %c0_i32_2 = arith.constant 0 : i32
    return %c0_i32, %c0_i32_0, %c0_i32_1 : i32, i32, i32
  }
  func.func @transform_3(%arg0: i32) -> (i32, i32) {
    %c0_i32 = arith.constant 0 : i32
    %c0_i32_0 = arith.constant 0 : i32
    %c0_i32_1 = arith.constant 0 : i32
    return %c0_i32, %c0_i32_0 : i32, i32
  }
  func.func @transform_4(%arg0: i32) -> (i32, i32, i32) {
    %c0_i32 = arith.constant 0 : i32
    %c0_i32_0 = arith.constant 0 : i32
    %c0_i32_1 = arith.constant 0 : i32
    %c0_i32_2 = arith.constant 0 : i32
    return %c0_i32, %c0_i32_0, %c0_i32_1 : i32, i32, i32
  }
  func.func @transform_5(%arg0: i32) -> (i32, i32) {
    %c0_i32 = arith.constant 0 : i32
    %c0_i32_0 = arith.constant 0 : i32
    %c0_i32_1 = arith.constant 0 : i32
    return %c0_i32, %c0_i32_0 : i32, i32
  }
  func.func @transform_6(%arg0: i32) -> (i32, i32, i32) {
    %c0_i32 = arith.constant 0 : i32
    %c0_i32_0 = arith.constant 0 : i32
    %c0_i32_1 = arith.constant 0 : i32
    return %arg0, %c0_i32, %c0_i32_0 : i32, i32, i32
  }
}

</mosaic_0001>

<bundles_post_ra>
// kernel: encoder_forward.4
= control target key start
LH: loop header
LB: loop body
LE: loop exit
PB: predicated region body
PF: predicated region fallthrough
CT: control target
= control target key end

     0   :  { %s1573_s12 = smov 0   ;;  %s1714_s0 = inlined_call_operand.vmem [shape: bf16[2,4,512], index: 0, kind: input, shape index: {}]   ;;  %s1715_s1 = inlined_call_operand.vmem [shape: bf16[9,8,4], index: 1, kind: input, shape index: {}]   ;;  %s1716_s2 = inlined_call_operand.vmem [shape: f32[8,1], index: 2, kind: input, shape index: {}]   ;;  %s1717_s3 = inlined_call_operand.vmem [shape: f32[2,8,384], index: 3, kind: output, shape index: {}]  }
   0x1 LB: > { %s1391_s13 = sadd.s32 4294967295, %s1539_s12   ;;  %p1395_p0 = scmp.ge.s32.totalorder %s1539_s12, 1  ;;  %s1539_s12 = sphi %s1573_s12, %s13_s12  }
   0x2   : > { %p137_p1 = scmp.lt.s32.totalorder %s1539_s12, 3 }
   0x4   : > { %p138_p2 = pnand %p1395_p0, %p137_p1 }
   0x5   : > { %p161_p3 = scmp.lt.s32.totalorder (!%p138_p2), %s1391_s13, 1  ;;  %s1545_s18 = smov (!%p138_p2), 127  }
   0x6   : > { %141 = sbr.rel (%p138_p2) target bundleno = 411 (0x19b), region = 32  ;;  %s1546_s19 = smov (!%p138_p2), 126  }
   0x7   : > { %s1547_s20 = smov (!%p138_p2), 110   ;;  %s1548_s21 = smov (!%p138_p2), 109  }
   0x8   : > { %s1549_s22 = smov (!%p138_p2), 108   ;;  %s1550_s23 = smov (!%p138_p2), 92  }
   0x9   : > { %s1551_s24 = smov (!%p138_p2), 91   ;;  %s1552_s25 = smov (!%p138_p2), 90  }
   0xb   : > { %v182_v0 = vlaneseq  ;;  %v1541_v1 = vmov 1983009808   ;;  %s1719_s13 = smov (!%p161_p3, %s1391_s13), 1  ;;  %v1542_v5 = vmov 0.0   ;;  %v1543_v6 = vmov 0   ;;  %v1315_v18 = vld [vmem:[%s1716_s2] sm:$0xff] }
   0xc   : > { %v180_v2 = vunpack.c.l.s4 %v1541_v1  ;;  %1455 = vmatprep.subr.bf16.mxu1 %v1542_v5  ;;  %253 = vmatprep.mubr.bf16.mxu0 %v1543_v6  ;;  %s1436_s14 = sshll.u32 %s1719_s13, 3  ;;  %vm1544_vm0 = vmmov 0   ;;  %vm203_vm1 = vcmask 1039360   ;;  %vm211_vm2 = vcmask 1041408   ;;  %v1399_v28 = vld [vmem:[%s1715_s1 + $0x4] sm:$0xf] }
   0xd   : > { %v183_v3 = vshrl.u32 %v182_v0, 7  ;;  %1530 = vset.pattern.permute.xlu0 %v1543_v6  ;;  %s165_s17 = scalar_lea.vmem %s1714_s0, %s1436_s14  ;;  %1457 = vmatprep.mubr.msk.bf16.mxu1 %vm1544_vm0, %v1542_v5  ;;  %vm207_vm3 = vcmask 31744   ;;  %vm441_vm4 = vcmask 1031168   ;;  %v172_v39 = vld [vmem:[%s1715_s1] sm:$0xf]  ;;  %vm570_vm5 = vcmask 900096  }
   0xe   : > { %v181_v4 = vunpack.c.0.s8 %v180_v2  ;;  %v176_v8 = vld [vmem:[%s165_s17] sm:$0xff]  ;;  %v1406_v49 = vld [vmem:[%s1715_s1 + $0x8] sm:$0xf]  ;;  %vm699_vm6 = vcmask 891904   ;;  %v1410_v59 = vld [vmem:[%s1715_s1 + $0xc] sm:$0xf] }
   0xf   : > { %v173_v9 = vld [vmem:[%s165_s17] sm:$0x3f]  ;;  %v178_v11 = vcombine.high %v176_v8, %v176_v8  ;;  %vm828_vm7 = vcmask 883712   ;;  %vm957_vm8 = vcmask 752640   ;;  %vm1086_vm9 = vcmask 744448  }
  0x10   : > { %v184_v7 = vsub.s32 %v181_v4, %v183_v3  ;;  %v303_v13 = vcombine.high %v173_v9, %v173_v9  ;;  %vm1215_vm10 = vcmask 736256  }
  0x12   : > { %v185_v10 = vrot.slane %v176_v8, %v184_v7  ;;  %v1592_v12 = vrot.slane %v173_v9, %v184_v7  ;;  %v192_v15 = vrot.slane %v178_v11, %v184_v7  ;;  %v1594_v16 = vrot.slane %v303_v13, %v184_v7  ;;  %v1414_v7 = vld [vmem:[%s1715_s1 + $0x10] sm:$0xf] }
  0x14   : > { %195 = vrot.lane.b32.xlu0 %v185_v10, %s1545_s18  ;;  %v193_v14 = vcombine.high %v185_v10, %v185_v10  ;;  %199 = vrot.lane.b32.xlu1 %v192_v15, %s1545_s18  ;;  %v194_v17 = vcombine.high %v192_v15, %v192_v15  ;;  %v318_v22 = vcombine.high %v1592_v12, %v1592_v12  ;;  %v323_v31 = vsel %vm211_vm2, %v1592_v12, 0 }
  0x15   : > { %v329_v33 = vsel %vm211_vm2, %v1594_v16, 0 }
  0x18   : > { %197 = vrot.lane.b32.xlu0 %v193_v14, %s1545_s18  ;;  %201 = vrot.lane.b32.xlu1 %v194_v17, %s1545_s18 }
  0x1c   : > { %433 = vrot.lane.b32.xlu0 %v185_v10, %s1546_s19  ;;  %435 = vrot.lane.b32.xlu1 %v193_v14, %s1546_s19 }
  0x20   : > { %437 = vrot.lane.b32.xlu0 %v192_v15, %s1546_s19  ;;  %439 = vrot.lane.b32.xlu1 %v194_v17, %s1546_s19 }
  0x24   : > { %562 = vrot.lane.b32.xlu0 %v185_v10, %s1547_s20  ;;  %564 = vrot.lane.b32.xlu1 %v193_v14, %s1547_s20 }
  0x28   : > { %566 = vrot.lane.b32.xlu0 %v192_v15, %s1547_s20  ;;  %568 = vrot.lane.b32.xlu1 %v194_v17, %s1547_s20 }
  0x2c   : > { %691 = vrot.lane.b32.xlu0 %v185_v10, %s1548_s21  ;;  %693 = vrot.lane.b32.xlu1 %v193_v14, %s1548_s21 }
  0x30   : > { %695 = vrot.lane.b32.xlu0 %v192_v15, %s1548_s21  ;;  %697 = vrot.lane.b32.xlu1 %v194_v17, %s1548_s21  ;;  %s1509_s21 = smul.u32 24, %s1719_s13 }
  0x34   : > { %820 = vrot.lane.b32.xlu0 %v185_v10, %s1549_s22  ;;  %822 = vrot.lane.b32.xlu1 %v193_v14, %s1549_s22 }
  0x38   : > { %824 = vrot.lane.b32.xlu0 %v192_v15, %s1549_s22  ;;  %826 = vrot.lane.b32.xlu1 %v194_v17, %s1549_s22 }
  0x3c   : > { %949 = vrot.lane.b32.xlu0 %v185_v10, %s1550_s23  ;;  %951 = vrot.lane.b32.xlu1 %v193_v14, %s1550_s23 }
  0x40   : > { %953 = vrot.lane.b32.xlu0 %v192_v15, %s1550_s23  ;;  %955 = vrot.lane.b32.xlu1 %v194_v17, %s1550_s23 }
  0x44   : > { %1078 = vrot.lane.b32.xlu0 %v185_v10, %s1551_s24  ;;  %1080 = vrot.lane.b32.xlu1 %v193_v14, %s1551_s24 }
  0x48   : > { %1082 = vrot.lane.b32.xlu0 %v192_v15, %s1551_s24  ;;  %1084 = vrot.lane.b32.xlu1 %v194_v17, %s1551_s24  ;;  %s170_s24 = scalar_lea.vmem %s1717_s3, %s1509_s21 }
  0x4c   : > { %1207 = vrot.lane.b32.xlu0 %v185_v10, %s1552_s25  ;;  %1209 = vrot.lane.b32.xlu1 %v193_v14, %s1552_s25 }
  0x50   : > { %1211 = vrot.lane.b32.xlu0 %v192_v15, %s1552_s25  ;;  %1213 = vrot.lane.b32.xlu1 %v194_v17, %s1552_s25  ;;  %v1418_v17 = vld [vmem:[%s1715_s1 + $0x14] sm:$0xf] }
  0x54   : > { %1318 = vperm.xlu0 %1530, %v1315_v18  }
  0x86   : > { %v196_v19 = vpop.permute.xlu0 %195  ;;  %v200_v20 = vpop.permute.xlu1 %199 }
  0x8a   : > { %v198_v21 = vpop.permute.xlu0 %197  ;;  %v202_v25 = vpop.permute.xlu1 %201 }
  0x8b   : > { %v205_v23 = vsel %vm203_vm1, %v198_v21, %v200_v20  ;;  %v204_v24 = vsel %vm203_vm1, %v196_v19, %v198_v21  ;;  %v206_v27 = vsel %vm203_vm1, %v200_v20, %v202_v25 }
  0x8c   : > { %1400 = vmatprep.subr.msk.bf16.mxu0 %vm211_vm2, %v205_v23  ;;  %v213_v26 = vsel %vm211_vm2, %v204_v24, 0  ;;  %v219_v29 = vsel %vm211_vm2, %v206_v27, 0  ;;  %v1422_v27 = vld [vmem:[%s1715_s1 + $0x18] sm:$0xf] }
  0x8d   : > { %236 = vmatpush1.bf16.msra.mxu0 %v213_v26  ;;  %1456 = vmatpush3.bf16.msra.mxu1 %v219_v29 }
  0x8e   : > { %v434_v30 = vpop.permute.xlu0 %433  ;;  %1403 = vmatprep.subr.msk.bf16.mxu0 %vm211_vm2, %v318_v22  ;;  %1461 = vmatprep.subr.bf16.mxu1 %v1542_v5  ;;  %v436_v32 = vpop.permute.xlu1 %435 }
  0x8f   : > { %v442_v35 = vsel %vm441_vm4, %v434_v30, %v436_v32 }
  0x90   : > { %1401 = vmatmul.mubr.msk.bf16.vlgmr.msra.gmra.mxu0 %vm207_vm3, %v1399_v28  ;;  %1458 = vmatmul.mubr.msk.bf16.vlgmr.msra.gmra.mxu1 %vm207_vm3, %v1399_v28  ;;  %v449_v40 = vsel %vm211_vm2, %v442_v35, 0 }
  0x91   : > { %346 = vmatpush1.bf16.msra.mxu0 %v323_v31  ;;  %363 = vmatprep.mubr.bf16.mxu0 %v1543_v6 }
  0x92   : > { %v438_v34 = vpop.permute.xlu0 %437  ;;  %1462 = vmatpush3.bf16.msra.mxu1 %v329_v33  ;;  %1463 = vmatprep.mubr.msk.bf16.mxu1 %vm1544_vm0, %v1542_v5  ;;  %v440_v37 = vpop.permute.xlu1 %439 }
  0x93   : > { %v443_v36 = vsel %vm441_vm4, %v436_v32, %v438_v34  ;;  %1467 = vmatprep.subr.bf16.mxu1 %v1542_v5  ;;  %v444_v38 = vsel %vm441_vm4, %v438_v34, %v440_v37  ;;  %v1426_v37 = vld [vmem:[%s1715_s1 + $0x1c] sm:$0xf] }
  0x94   : > { %1407 = vmatprep.subr.msk.bf16.mxu0 %vm211_vm2, %v443_v36  ;;  %v455_v42 = vsel %vm211_vm2, %v444_v38, 0 }
  0x96   : > { %v563_v41 = vpop.permute.xlu0 %562  ;;  %v565_v43 = vpop.permute.xlu1 %564 }
  0x97   : > { %v571_v45 = vsel %vm570_vm5, %v563_v41, %v565_v43 }
  0x98   : > { %1404 = vmatmul.mubr.msk.bf16.vlgmr.msra.gmra.mxu0 %vm207_vm3, %v172_v39  ;;  %1464 = vmatmul.mubr.msk.bf16.vlgmr.msra.gmra.mxu1 %vm207_vm3, %v172_v39  ;;  %v578_v50 = vsel %vm211_vm2, %v571_v45, 0 }
  0x99   : > { %472 = vmatpush1.bf16.msra.mxu0 %v449_v40  ;;  %489 = vmatprep.mubr.bf16.mxu0 %v1543_v6  ;;  %v1430_v40 = vld [vmem:[%s1715_s1 + $0x20] sm:$0xf] }
  0x9a   : > { %v567_v44 = vpop.permute.xlu0 %566  ;;  %1468 = vmatpush3.bf16.msra.mxu1 %v455_v42  ;;  %1469 = vmatprep.mubr.msk.bf16.mxu1 %vm1544_vm0, %v1542_v5  ;;  %v569_v47 = vpop.permute.xlu1 %568 }
  0x9b   : > { %v572_v46 = vsel %vm570_vm5, %v565_v43, %v567_v44  ;;  %1473 = vmatprep.subr.bf16.mxu1 %v1542_v5  ;;  %v573_v48 = vsel %vm570_vm5, %v567_v44, %v569_v47 }
  0x9c   : > { %1411 = vmatprep.subr.msk.bf16.mxu0 %vm211_vm2, %v572_v46  ;;  %v584_v52 = vsel %vm211_vm2, %v573_v48, 0 }
  0x9e   : > { %v692_v51 = vpop.permute.xlu0 %691  ;;  %v694_v53 = vpop.permute.xlu1 %693 }
  0x9f   : > { %v700_v55 = vsel %vm699_vm6, %v692_v51, %v694_v53 }
  0xa0   : > { %1408 = vmatmul.mubr.msk.bf16.vlgmr.msra.gmra.mxu0 %vm207_vm3, %v1406_v49  ;;  %1470 = vmatmul.mubr.msk.bf16.vlgmr.msra.gmra.mxu1 %vm207_vm3, %v1406_v49  ;;  %v707_v60 = vsel %vm211_vm2, %v700_v55, 0 }
  0xa1   : > { %601 = vmatpush1.bf16.msra.mxu0 %v578_v50  ;;  %618 = vmatprep.mubr.bf16.mxu0 %v1543_v6 }
  0xa2   : > { %v696_v54 = vpop.permute.xlu0 %695  ;;  %1474 = vmatpush3.bf16.msra.mxu1 %v584_v52  ;;  %1475 = vmatprep.mubr.msk.bf16.mxu1 %vm1544_vm0, %v1542_v5  ;;  %v698_v57 = vpop.permute.xlu1 %697 }
  0xa3   : > { %v701_v56 = vsel %vm699_vm6, %v694_v53, %v696_v54  ;;  %1479 = vmatprep.subr.bf16.mxu1 %v1542_v5  ;;  %v702_v58 = vsel %vm699_vm6, %v696_v54, %v698_v57 }
  0xa4   : > { %1415 = vmatprep.subr.msk.bf16.mxu0 %vm211_vm2, %v701_v56  ;;  %v713_v62 = vsel %vm211_vm2, %v702_v58, 0 }
  0xa6   : > { %v821_v61 = vpop.permute.xlu0 %820  ;;  %v823_v63 = vpop.permute.xlu1 %822 }
  0xa7   : > { %v829_v1 = vsel %vm828_vm7, %v821_v61, %v823_v63 }
  0xa8   : > { %1412 = vmatmul.mubr.msk.bf16.vlgmr.msra.gmra.mxu0 %vm207_vm3, %v1410_v59  ;;  %1476 = vmatmul.mubr.msk.bf16.vlgmr.msra.gmra.mxu1 %vm207_vm3, %v1410_v59  ;;  %v836_v8 = vsel %vm211_vm2, %v829_v1, 0 }
  0xa9   : > { %730 = vmatpush1.bf16.msra.mxu0 %v707_v60  ;;  %747 = vmatprep.mubr.bf16.mxu0 %v1543_v6 }
  0xaa   : > { %v825_v0 = vpop.permute.xlu0 %824  ;;  %1480 = vmatpush3.bf16.msra.mxu1 %v713_v62  ;;  %1481 = vmatprep.mubr.msk.bf16.mxu1 %vm1544_vm0, %v1542_v5  ;;  %v827_v3 = vpop.permute.xlu1 %826 }
  0xab   : > { %v830_v2 = vsel %vm828_vm7, %v823_v63, %v825_v0  ;;  %1485 = vmatprep.subr.bf16.mxu1 %v1542_v5  ;;  %v831_v4 = vsel %vm828_vm7, %v825_v0, %v827_v3 }
  0xac   : > { %1419 = vmatprep.subr.msk.bf16.mxu0 %vm211_vm2, %v830_v2  ;;  %v842_v10 = vsel %vm211_vm2, %v831_v4, 0 }
  0xae   : > { %v950_v9 = vpop.permute.xlu0 %949  ;;  %v952_v11 = vpop.permute.xlu1 %951 }
  0xaf   : > { %v958_v13 = vsel %vm957_vm8, %v950_v9, %v952_v11 }
  0xb0   : > { %1416 = vmatmul.mubr.msk.bf16.vlgmr.msra.gmra.mxu0 %vm207_vm3, %v1414_v7  ;;  %1482 = vmatmul.mubr.msk.bf16.vlgmr.msra.gmra.mxu1 %vm207_vm3, %v1414_v7  ;;  %v965_v18 = vsel %vm211_vm2, %v958_v13, 0 }
  0xb1   : > { %859 = vmatpush1.bf16.msra.mxu0 %v836_v8  ;;  %876 = vmatprep.mubr.bf16.mxu0 %v1543_v6 }
  0xb2   : > { %v954_v12 = vpop.permute.xlu0 %953  ;;  %1486 = vmatpush3.bf16.msra.mxu1 %v842_v10  ;;  %1487 = vmatprep.mubr.msk.bf16.mxu1 %vm1544_vm0, %v1542_v5  ;;  %v956_v15 = vpop.permute.xlu1 %955 }
  0xb3   : > { %v959_v14 = vsel %vm957_vm8, %v952_v11, %v954_v12  ;;  %1491 = vmatprep.subr.bf16.mxu1 %v1542_v5  ;;  %v960_v16 = vsel %vm957_vm8, %v954_v12, %v956_v15 }
  0xb4   : > { %1423 = vmatprep.subr.msk.bf16.mxu0 %vm211_vm2, %v959_v14  ;;  %v971_v20 = vsel %vm211_vm2, %v960_v16, 0 }
  0xb6   : > { %v1079_v19 = vpop.permute.xlu0 %1078  ;;  %v1081_v21 = vpop.permute.xlu1 %1080 }
  0xb7   : > { %v1087_v23 = vsel %vm1086_vm9, %v1079_v19, %v1081_v21 }
  0xb8   : > { %1420 = vmatmul.mubr.msk.bf16.vlgmr.msra.gmra.mxu0 %vm207_vm3, %v1418_v17  ;;  %1488 = vmatmul.mubr.msk.bf16.vlgmr.msra.gmra.mxu1 %vm207_vm3, %v1418_v17  ;;  %v1094_v28 = vsel %vm211_vm2, %v1087_v23, 0 }
  0xb9   : > { %988 = vmatpush1.bf16.msra.mxu0 %v965_v18  ;;  %1005 = vmatprep.mubr.bf16.mxu0 %v1543_v6 }
  0xba   : > { %v1083_v22 = vpop.permute.xlu0 %1082  ;;  %1492 = vmatpush3.bf16.msra.mxu1 %v971_v20  ;;  %1493 = vmatprep.mubr.msk.bf16.mxu1 %vm1544_vm0, %v1542_v5  ;;  %v1085_v25 = vpop.permute.xlu1 %1084 }
  0xbb   : > { %v1088_v24 = vsel %vm1086_vm9, %v1081_v21, %v1083_v22  ;;  %1497 = vmatprep.subr.bf16.mxu1 %v1542_v5  ;;  %v1089_v26 = vsel %vm1086_vm9, %v1083_v22, %v1085_v25 }
  0xbc   : > { %1427 = vmatprep.subr.msk.bf16.mxu0 %vm211_vm2, %v1088_v24  ;;  %v1100_v30 = vsel %vm211_vm2, %v1089_v26, 0 }
  0xbe   : > { %v1208_v29 = vpop.permute.xlu0 %1207  ;;  %v1210_v31 = vpop.permute.xlu1 %1209 }
  0xbf   : > { %v1216_v33 = vsel %vm1215_vm10, %v1208_v29, %v1210_v31 }
  0xc0   : > { %1424 = vmatmul.mubr.msk.bf16.vlgmr.msra.gmra.mxu0 %vm207_vm3, %v1422_v27  ;;  %1494 = vmatmul.mubr.msk.bf16.vlgmr.msra.gmra.mxu1 %vm207_vm3, %v1422_v27  ;;  %v1223_v38 = vsel %vm211_vm2, %v1216_v33, 0 }
  0xc1   : > { %1117 = vmatpush1.bf16.msra.mxu0 %v1094_v28  ;;  %1134 = vmatprep.mubr.bf16.mxu0 %v1543_v6 }
  0xc2   : > { %v1212_v32 = vpop.permute.xlu0 %1211  ;;  %1498 = vmatpush3.bf16.msra.mxu1 %v1100_v30  ;;  %1499 = vmatprep.mubr.msk.bf16.mxu1 %vm1544_vm0, %v1542_v5  ;;  %v1214_v35 = vpop.permute.xlu1 %1213 }
  0xc3   : > { %v1217_v34 = vsel %vm1215_vm10, %v1210_v31, %v1212_v32  ;;  %1503 = vmatprep.subr.bf16.mxu1 %v1542_v5  ;;  %v1218_v36 = vsel %vm1215_vm10, %v1212_v32, %v1214_v35 }
  0xc4   : > { %1431 = vmatprep.subr.msk.bf16.mxu0 %vm211_vm2, %v1217_v34  ;;  %v1229_v39 = vsel %vm211_vm2, %v1218_v36, 0 }
  0xc8   : > { %1428 = vmatmul.mubr.msk.bf16.vlgmr.msra.gmra.mxu0 %vm207_vm3, %v1426_v37  ;;  %1500 = vmatmul.mubr.msk.bf16.vlgmr.msra.gmra.mxu1 %vm207_vm3, %v1426_v37 }
  0xc9   : > { %1246 = vmatpush1.bf16.msra.mxu0 %v1223_v38  ;;  %1263 = vmatprep.mubr.bf16.mxu0 %v1543_v6 }
  0xca   : > { %1504 = vmatpush3.bf16.msra.mxu1 %v1229_v39  ;;  %1505 = vmatprep.mubr.msk.bf16.mxu1 %vm1544_vm0, %v1542_v5 }
  0xd0   : > { %1432 = vmatmul.mubr.msk.bf16.vlgmr.msra.gmra.mxu0 %vm207_vm3, %v1430_v40  ;;  %1506 = vmatmul.mubr.msk.bf16.vlgmr.msra.gmra.mxu1 %vm207_vm3, %v1430_v40 }
 0x150   : > { %v255_v41 = vpop.f32.mrf.mxu0  ;;  %v296_v43 = vpop.f32.mrf.mxu1 }
 0x152   : > { %v257_v42 = vpop.f32.mrf.mxu0  ;;  %v1459_v45 = vpop.f32.mrf.mxu1 }
 0x154   : > { %v259_v44 = vpop.f32.mrf.mxu0  ;;  %v299_v46 = vpop.f32.mrf.mxu1 }
 0x156   : > { %v260_v6 = vpop.f32.mrf.mxu0  ;;  %v1460_v47 = vpop.f32.mrf.mxu1 }
 0x158   : > { %v365_v48 = vpop.f32.mrf.mxu0  ;;  %v406_v50 = vpop.f32.mrf.mxu1 }
 0x159   : > { %v366_v28 = vadd.f32 %v365_v48, %v255_v41  ;;  %v407_v32 = vadd.f32 %v406_v50, %v296_v43 }
 0x15a   : > { %v367_v49 = vpop.f32.mrf.mxu0  ;;  %v1465_v51 = vpop.f32.mrf.mxu1 }
 0x15b   : > { %v368_v31 = vadd.f32 %v367_v49, %v257_v42 }
 0x15c   : > { %v369_v5 = vpop.f32.mrf.mxu0  ;;  %v409_v53 = vpop.f32.mrf.mxu1 }
 0x15e   : > { %v370_v52 = vpop.f32.mrf.mxu0  ;;  %v1466_v54 = vpop.f32.mrf.mxu1 }
 0x160   : > { %v491_v55 = vpop.f32.mrf.mxu0  ;;  %v532_v57 = vpop.f32.mrf.mxu1 }
 0x161   : > { %v538_v33 = vadd.f32 %v491_v55, %v366_v28  ;;  %v540_v37 = vadd.f32 %v532_v57, %v407_v32  ;;  %v1319_v57 = vpop.permute.xlu0 %1318 }
 0x162   : > { %v493_v56 = vpop.f32.mrf.mxu0  ;;  %v1471_v59 = vpop.f32.mrf.mxu1 }
 0x163   : > { %v539_v36 = vadd.f32 %v493_v56, %v368_v31 }
 0x164   : > { %v495_v58 = vpop.f32.mrf.mxu0  ;;  %v535_v61 = vpop.f32.mrf.mxu1 }
 0x166   : > { %v496_v60 = vpop.f32.mrf.mxu0  ;;  %v1472_v62 = vpop.f32.mrf.mxu1 }
 0x168   : > { %v620_v63 = vpop.f32.mrf.mxu0  ;;  %v661_v1 = vpop.f32.mrf.mxu1 }
 0x169   : > { %v667_v38 = vadd.f32 %v620_v63, %v538_v33  ;;  %v669_v45 = vadd.f32 %v661_v1, %v540_v37 }
 0x16a   : > { %v622_v0 = vpop.f32.mrf.mxu0  ;;  %v1477_v3 = vpop.f32.mrf.mxu1 }
 0x16b   : > { %v668_v44 = vadd.f32 %v622_v0, %v539_v36 }
 0x16c   : > { %v624_v2 = vpop.f32.mrf.mxu0  ;;  %v664_v7 = vpop.f32.mrf.mxu1 }
 0x16e   : > { %v625_v4 = vpop.f32.mrf.mxu0  ;;  %v1478_v8 = vpop.f32.mrf.mxu1 }
 0x170   : > { %v749_v9 = vpop.f32.mrf.mxu0  ;;  %v790_v11 = vpop.f32.mrf.mxu1 }
 0x171   : > { %v796_v6 = vadd.f32 %v749_v9, %v667_v38  ;;  %v798_v51 = vadd.f32 %v790_v11, %v669_v45 }
 0x172   : > { %v751_v10 = vpop.f32.mrf.mxu0  ;;  %v1483_v13 = vpop.f32.mrf.mxu1 }
 0x173   : > { %v797_v5 = vadd.f32 %v751_v10, %v668_v44 }
 0x174   : > { %v753_v12 = vpop.f32.mrf.mxu0  ;;  %v793_v15 = vpop.f32.mrf.mxu1 }
 0x176   : > { %v754_v14 = vpop.f32.mrf.mxu0  ;;  %v1484_v16 = vpop.f32.mrf.mxu1 }
 0x178   : > { %v878_v17 = vpop.f32.mrf.mxu0  ;;  %v919_v19 = vpop.f32.mrf.mxu1 }
 0x179   : > { %v925_v41 = vadd.f32 %v878_v17, %v796_v6  ;;  %v927_v49 = vadd.f32 %v919_v19, %v798_v51 }
 0x17a   : > { %v880_v18 = vpop.f32.mrf.mxu0  ;;  %v1489_v21 = vpop.f32.mrf.mxu1 }
 0x17b   : > { %v926_v43 = vadd.f32 %v880_v18, %v797_v5 }
 0x17c   : > { %v882_v20 = vpop.f32.mrf.mxu0  ;;  %v922_v23 = vpop.f32.mrf.mxu1 }
 0x17e   : > { %v883_v22 = vpop.f32.mrf.mxu0  ;;  %v1490_v24 = vpop.f32.mrf.mxu1 }
 0x180   : > { %v1007_v25 = vpop.f32.mrf.mxu0  ;;  %v1048_v27 = vpop.f32.mrf.mxu1 }
 0x181   : > { %v1054_v50 = vadd.f32 %v1007_v25, %v925_v41  ;;  %v1056_v55 = vadd.f32 %v1048_v27, %v927_v49 }
 0x182   : > { %v1009_v26 = vpop.f32.mrf.mxu0  ;;  %v1495_v30 = vpop.f32.mrf.mxu1 }
 0x183   : > { %v1055_v54 = vadd.f32 %v1009_v26, %v926_v43 }
 0x184   : > { %v1011_v29 = vpop.f32.mrf.mxu0  ;;  %v1051_v35 = vpop.f32.mrf.mxu1 }
 0x186   : > { %v1012_v34 = vpop.f32.mrf.mxu0  ;;  %v1496_v39 = vpop.f32.mrf.mxu1 }
 0x188   : > { %v1136_v40 = vpop.f32.mrf.mxu0  ;;  %v1177_v47 = vpop.f32.mrf.mxu1 }
 0x189   : > { %v1183_v56 = vadd.f32 %v1136_v40, %v1054_v50  ;;  %v1185_v61 = vadd.f32 %v1177_v47, %v1056_v55 }
 0x18a   : > { %v1138_v46 = vpop.f32.mrf.mxu0  ;;  %v1501_v42 = vpop.f32.mrf.mxu1 }
 0x18b   : > { %v1184_v60 = vadd.f32 %v1138_v46, %v1055_v54 }
 0x18c   : > { %v1140_v48 = vpop.f32.mrf.mxu0  ;;  %v1180_v53 = vpop.f32.mrf.mxu1 }
 0x18e   : > { %v1141_v52 = vpop.f32.mrf.mxu0  ;;  %v1502_v58 = vpop.f32.mrf.mxu1 }
 0x190   : > { %v1265_v59 = vpop.f32.mrf.mxu0  ;;  %v1306_v0 = vpop.f32.mrf.mxu1 }
 0x191   : > { %v1312_v62 = vadd.f32 %v1265_v59, %v1183_v56  ;;  %v1314_v3 = vadd.f32 %v1306_v0, %v1185_v61 }
 0x192   : > { %v1267_v63 = vpop.f32.mrf.mxu0  ;;  %v1507_v7 = vpop.f32.mrf.mxu1 }
 0x193   : > { %v1321_v1 = vadd.f32 %v1319_v57, %v1312_v62  ;;  %v1313_v2 = vadd.f32 %v1267_v63, %v1184_v60  ;;  %v1323_v10 = vadd.f32 %v1319_v57, %v1314_v3 }
 0x194   : > { %v1269_v4 = vpop.f32.mrf.mxu0  ;;  %v1309_v12 = vpop.f32.mrf.mxu1 }
 0x195   : > { %vm1324_vm11 = vcmp.gt.f32.partialorder %v1321_v1, 0.0  ;;  %v1327_v8 = vmul.f32 0.2, %v1321_v1  ;;  %v1322_v9 = vadd.f32 %v1319_v57, %v1313_v2  ;;  %vm1326_vm13 = vcmp.gt.f32.partialorder %v1323_v10, 0.0 }
 0x196   : > { %v1270_v11 = vpop.f32.mrf.mxu0  ;;  %v1329_v15 = vmul.f32 0.2, %v1323_v10  ;;  %v1508_v16 = vpop.f32.mrf.mxu1 }
 0x197   : > { %v1330_v13 = vsel %vm1324_vm11, %v1321_v1, %v1327_v8  ;;  %vm1325_vm12 = vcmp.gt.f32.partialorder %v1322_v9, 0.0  ;;  %v1328_v14 = vmul.f32 0.2, %v1322_v9 }
 0x198   : > { %1333 = vst [vmem:[%s170_s24] sm:$0xff] %v1330_v13  ;;  %v1332_v18 = vsel %vm1326_vm13, %v1323_v10, %v1329_v15 }
 0x199   : > { %v1331_v17 = vsel %vm1325_vm12, %v1322_v9, %v1328_v14  ;;  %1335 = vst [vmem:[%s170_s24 + $0x10] sm:$0xff] %v1332_v18 }
 0x19a   : > { %1334 = vst [vmem:[%s170_s24 + $0x8] sm:$0xff] %v1331_v17 }
 0x19b PF: > { %s13_s12 = sadd.s32 1, %s1539_s12  }
 0x19c   : > { %p10_p4 = scmp.ge.s32.totalorder %s13_s12, 4  }
 0x19e   :  { %12 = sbr.rel (!%p10_p4) target bundleno = 1 (0x1), region = 70 }

// kernel: encoder_forward.5
= control target key start
LH: loop header
LB: loop body
LE: loop exit
PB: predicated region body
PF: predicated region fallthrough
CT: control target
= control target key end

     0   :  { %s1583_s12 = smov 0   ;;  %s1744_s0 = inlined_call_operand.vmem [shape: bf16[2,8,512], index: 0, kind: input, shape index: {}]   ;;  %s1745_s1 = inlined_call_operand.vmem [shape: bf16[9,16,8], index: 1, kind: input, shape index: {}]   ;;  %s1746_s2 = inlined_call_operand.vmem [shape: f32[16,1], index: 2, kind: input, shape index: {}]   ;;  %s1747_s3 = inlined_call_operand.vmem [shape: f32[2,16,384], index: 3, kind: output, shape index: {}]  }
   0x1 LB: > { %s1366_s13 = sadd.s32 4294967295, %s1550_s12   ;;  %p1370_p0 = scmp.ge.s32.totalorder %s1550_s12, 1  ;;  %s1550_s12 = sphi %s1583_s12, %s13_s12  }
   0x2   : > { %p137_p1 = scmp.lt.s32.totalorder %s1550_s12, 3 }
   0x4   : > { %p138_p2 = pnand %p1370_p0, %p137_p1 }
   0x5   : > { %p161_p3 = scmp.lt.s32.totalorder (!%p138_p2), %s1366_s13, 1  ;;  %s1555_s18 = smov (!%p138_p2), 127  }
   0x6   : > { %141 = sbr.rel (%p138_p2) target bundleno = 412 (0x19c), region = 32  ;;  %s1556_s19 = smov (!%p138_p2), 126  }
   0x7   : > { %s1557_s20 = smov (!%p138_p2), 110   ;;  %s1558_s21 = smov (!%p138_p2), 109  }
   0x8   : > { %s1559_s22 = smov (!%p138_p2), 108   ;;  %s1560_s23 = smov (!%p138_p2), 92  }
   0x9   : > { %s1561_s24 = smov (!%p138_p2), 91   ;;  %s1562_s25 = smov (!%p138_p2), 90  }
   0xb   : > { %v1552_v0 = vmov 0.0   ;;  %s1749_s13 = smov (!%p161_p3, %s1366_s13), 1  ;;  %v1553_v1 = vmov 0   ;;  %vm1554_vm0 = vmmov 0   ;;  %v1269_v8 = vld [vmem:[%s1746_s2] sm:$0xff]  ;;  %v1270_v9 = vld [vmem:[%s1746_s2 + $0x8] sm:$0xff] }
   0xc   : > { %1454 = vmatprep.subr.bf16.mxu1 %v1552_v0  ;;  %254 = vmatprep.mubr.bf16.mxu0 %v1553_v1  ;;  %s1435_s14 = sshll.u32 %s1749_s13, 4  ;;  %vm204_vm1 = vcmask 1039360   ;;  %vm212_vm2 = vcmask 1043456   ;;  %v1534_v20 = vld [vmem:[%s1745_s1 + $0x8] sm:$0xff]   ;;  %vm208_vm3 = vcmask 64512   ;;  %vm431_vm4 = vcmask 1031168  }
   0xd   : > { %1456 = vmatprep.mubr.msk.bf16.mxu1 %vm1554_vm0, %v1552_v0  ;;  %1528 = vset.pattern.permute.xlu0 %v1553_v1  ;;  %s1603_s17 = scalar_lea.vmem %s1744_s0, %s1435_s14  ;;  %v1536_v30 = vld [vmem:[%s1745_s1] sm:$0xff]   ;;  %vm553_vm5 = vcmask 900096   ;;  %v1537_v40 = vld [vmem:[%s1745_s1 + $0x10] sm:$0xff]   ;;  %vm675_vm6 = vcmask 891904   ;;  %v1538_v50 = vld [vmem:[%s1745_s1 + $0x18] sm:$0xff]   ;;  %vm797_vm7 = vcmask 883712  }
   0xe   : > { %1529 = vset.pattern.permute.xlu1 %v1553_v1  ;;  %v180_v2 = vld [vmem:[%s1603_s17 + $0x8] sm:$0xff]  ;;  %v179_v3 = vld [vmem:[%s1603_s17] sm:$0xff]  ;;  %vm919_vm8 = vcmask 752640   ;;  %vm1041_vm9 = vcmask 744448   ;;  %vm1163_vm10 = vcmask 736256  }
   0xf   : > { %v1379_v4 = vcombine.low %v180_v2, %v180_v2  ;;  %v1607_v5 = vcombine.low %v179_v3, %v179_v3  ;;  %v1380_v6 = vcombine.high %v180_v2, %v180_v2  ;;  %v1378_v7 = vcombine.high %v179_v3, %v179_v3  ;;  %v1535_v14 = vld [vmem:[%s1603_s17 + $0x8] ss:$0 sps:$4 sm:$0xff]   ;;  %v1539_v60 = vld [vmem:[%s1745_s1 + $0x20] sm:$0xff]  }
  0x10   : > { %v329_v24 = vsel %vm212_vm2, %v1535_v14, 0 }
  0x11   : > { %200 = vrot.lane.b32.xlu1 %v1379_v4, %s1555_s18  ;;  %196 = vrot.lane.b32.xlu0 %v1607_v5, %s1555_s18  ;;  %v323_v22 = vsel %vm212_vm2, %v1607_v5, 0 }
  0x15   : > { %202 = vrot.lane.b32.xlu1 %v1380_v6, %s1555_s18  ;;  %198 = vrot.lane.b32.xlu0 %v1378_v7, %s1555_s18 }
  0x19   : > { %423 = vrot.lane.b32.xlu0 %v1607_v5, %s1556_s19  ;;  %425 = vrot.lane.b32.xlu1 %v1378_v7, %s1556_s19 }
  0x1d   : > { %427 = vrot.lane.b32.xlu0 %v1379_v4, %s1556_s19  ;;  %429 = vrot.lane.b32.xlu1 %v1380_v6, %s1556_s19 }
  0x21   : > { %545 = vrot.lane.b32.xlu0 %v1607_v5, %s1557_s20  ;;  %547 = vrot.lane.b32.xlu1 %v1378_v7, %s1557_s20 }
  0x25   : > { %549 = vrot.lane.b32.xlu0 %v1379_v4, %s1557_s20  ;;  %551 = vrot.lane.b32.xlu1 %v1380_v6, %s1557_s20 }
  0x29   : > { %667 = vrot.lane.b32.xlu0 %v1607_v5, %s1558_s21  ;;  %669 = vrot.lane.b32.xlu1 %v1378_v7, %s1558_s21 }
  0x2d   : > { %671 = vrot.lane.b32.xlu0 %v1379_v4, %s1558_s21  ;;  %673 = vrot.lane.b32.xlu1 %v1380_v6, %s1558_s21 }
  0x31   : > { %789 = vrot.lane.b32.xlu0 %v1607_v5, %s1559_s22  ;;  %791 = vrot.lane.b32.xlu1 %v1378_v7, %s1559_s22 }
  0x35   : > { %793 = vrot.lane.b32.xlu0 %v1379_v4, %s1559_s22  ;;  %795 = vrot.lane.b32.xlu1 %v1380_v6, %s1559_s22 }
  0x39   : > { %911 = vrot.lane.b32.xlu0 %v1607_v5, %s1560_s23  ;;  %913 = vrot.lane.b32.xlu1 %v1378_v7, %s1560_s23 }
  0x3d   : > { %915 = vrot.lane.b32.xlu0 %v1379_v4, %s1560_s23  ;;  %917 = vrot.lane.b32.xlu1 %v1380_v6, %s1560_s23  ;;  %s1508_s23 = smul.u32 48, %s1749_s13 }
  0x3f   : > { %s1733_s26 = scalar_lea.vmem %s1747_s3, %s1508_s23 }
  0x41   : > { %1033 = vrot.lane.b32.xlu0 %v1607_v5, %s1561_s24  ;;  %1035 = vrot.lane.b32.xlu1 %v1378_v7, %s1561_s24 }
  0x45   : > { %1037 = vrot.lane.b32.xlu0 %v1379_v4, %s1561_s24  ;;  %1039 = vrot.lane.b32.xlu1 %v1380_v6, %s1561_s24 }
  0x49   : > { %1155 = vrot.lane.b32.xlu0 %v1607_v5, %s1562_s25  ;;  %1157 = vrot.lane.b32.xlu1 %v1378_v7, %s1562_s25 }
  0x4d   : > { %1159 = vrot.lane.b32.xlu0 %v1379_v4, %s1562_s25  ;;  %1161 = vrot.lane.b32.xlu1 %v1380_v6, %s1562_s25 }
  0x51   : > { %1273 = vperm.xlu0 %1528, %v1269_v8   ;;  %1278 = vperm.xlu1 %1529, %v1270_v9   ;;  %v1540_v8 = vld [vmem:[%s1745_s1 + $0x28] sm:$0xff]  }
  0x83   : > { %v201_v10 = vpop.permute.xlu1 %200  ;;  %v197_v11 = vpop.permute.xlu0 %196 }
  0x87   : > { %v203_v12 = vpop.permute.xlu1 %202  ;;  %v199_v13 = vpop.permute.xlu0 %198 }
  0x88   : > { %v206_v15 = vsel %vm204_vm1, %v199_v13, %v201_v10  ;;  %v205_v16 = vsel %vm204_vm1, %v197_v11, %v199_v13  ;;  %v207_v17 = vsel %vm204_vm1, %v201_v10, %v203_v12 }
  0x89   : > { %1381 = vmatprep.subr.msk.bf16.mxu0 %vm212_vm2, %v206_v15  ;;  %v214_v18 = vsel %vm212_vm2, %v205_v16, 0  ;;  %v220_v19 = vsel %vm212_vm2, %v207_v17, 0 }
  0x8a   : > { %237 = vmatpush1.bf16.msra.mxu0 %v214_v18  ;;  %1455 = vmatpush3.bf16.msra.mxu1 %v220_v19  ;;  %v1541_v18 = vld [vmem:[%s1745_s1 + $0x30] sm:$0xff]  }
  0x8b   : > { %v424_v21 = vpop.permute.xlu0 %423  ;;  %1388 = vmatprep.subr.msk.bf16.mxu0 %vm212_vm2, %v1378_v7  ;;  %1460 = vmatprep.subr.bf16.mxu1 %v1552_v0  ;;  %v426_v23 = vpop.permute.xlu1 %425 }
  0x8c   : > { %v432_v27 = vsel %vm431_vm4, %v424_v21, %v426_v23 }
  0x8d   : > { %1382 = vmatmul.mubr.msk.bf16.vlgmr.msra.gmra.mxu0 %vm208_vm3, %v1534_v20  ;;  %1457 = vmatmul.mubr.msk.bf16.vlgmr.msra.gmra.mxu1 %vm208_vm3, %v1534_v20  ;;  %v439_v31 = vsel %vm212_vm2, %v432_v27, 0 }
  0x8e   : > { %346 = vmatpush1.bf16.msra.mxu0 %v323_v22  ;;  %1461 = vmatpush3.bf16.msra.mxu1 %v329_v24 }
  0x8f   : > { %v428_v25 = vpop.permute.xlu0 %427  ;;  %v430_v26 = vpop.permute.xlu1 %429  ;;  %363 = vmatprep.mubr.bf16.mxu0 %v1553_v1  ;;  %1462 = vmatprep.mubr.msk.bf16.mxu1 %vm1554_vm0, %v1552_v0 }
  0x90   : > { %v433_v28 = vsel %vm431_vm4, %v426_v23, %v428_v25  ;;  %v434_v29 = vsel %vm431_vm4, %v428_v25, %v430_v26  ;;  %1466 = vmatprep.subr.bf16.mxu1 %v1552_v0 }
  0x91   : > { %1394 = vmatprep.subr.msk.bf16.mxu0 %vm212_vm2, %v433_v28  ;;  %v445_v32 = vsel %vm212_vm2, %v434_v29, 0  ;;  %v1542_v28 = vld [vmem:[%s1745_s1 + $0x38] sm:$0xff]  }
  0x93   : > { %v546_v33 = vpop.permute.xlu0 %545  ;;  %v548_v34 = vpop.permute.xlu1 %547 }
  0x94   : > { %v554_v37 = vsel %vm553_vm5, %v546_v33, %v548_v34 }
  0x95   : > { %1389 = vmatmul.mubr.msk.bf16.vlgmr.msra.gmra.mxu0 %vm208_vm3, %v1536_v30  ;;  %1463 = vmatmul.mubr.msk.bf16.vlgmr.msra.gmra.mxu1 %vm208_vm3, %v1536_v30  ;;  %v561_v41 = vsel %vm212_vm2, %v554_v37, 0 }
  0x96   : > { %462 = vmatpush1.bf16.msra.mxu0 %v439_v31  ;;  %1467 = vmatpush3.bf16.msra.mxu1 %v445_v32  ;;  %v1543_v31 = vld [vmem:[%s1745_s1 + $0x40] sm:$0xff]  }
  0x97   : > { %v550_v35 = vpop.permute.xlu0 %549  ;;  %v552_v36 = vpop.permute.xlu1 %551  ;;  %479 = vmatprep.mubr.bf16.mxu0 %v1553_v1  ;;  %1468 = vmatprep.mubr.msk.bf16.mxu1 %vm1554_vm0, %v1552_v0 }
  0x98   : > { %v555_v38 = vsel %vm553_vm5, %v548_v34, %v550_v35  ;;  %v556_v39 = vsel %vm553_vm5, %v550_v35, %v552_v36  ;;  %1472 = vmatprep.subr.bf16.mxu1 %v1552_v0 }
  0x99   : > { %1400 = vmatprep.subr.msk.bf16.mxu0 %vm212_vm2, %v555_v38  ;;  %v567_v42 = vsel %vm212_vm2, %v556_v39, 0 }
  0x9b   : > { %v668_v43 = vpop.permute.xlu0 %667  ;;  %v670_v44 = vpop.permute.xlu1 %669 }
  0x9c   : > { %v676_v47 = vsel %vm675_vm6, %v668_v43, %v670_v44 }
  0x9d   : > { %1395 = vmatmul.mubr.msk.bf16.vlgmr.msra.gmra.mxu0 %vm208_vm3, %v1537_v40  ;;  %1469 = vmatmul.mubr.msk.bf16.vlgmr.msra.gmra.mxu1 %vm208_vm3, %v1537_v40  ;;  %v683_v51 = vsel %vm212_vm2, %v676_v47, 0 }
  0x9e   : > { %584 = vmatpush1.bf16.msra.mxu0 %v561_v41  ;;  %1473 = vmatpush3.bf16.msra.mxu1 %v567_v42 }
  0x9f   : > { %v672_v45 = vpop.permute.xlu0 %671  ;;  %v674_v46 = vpop.permute.xlu1 %673  ;;  %601 = vmatprep.mubr.bf16.mxu0 %v1553_v1  ;;  %1474 = vmatprep.mubr.msk.bf16.mxu1 %vm1554_vm0, %v1552_v0 }
  0xa0   : > { %v677_v48 = vsel %vm675_vm6, %v670_v44, %v672_v45  ;;  %v678_v49 = vsel %vm675_vm6, %v672_v45, %v674_v46  ;;  %1478 = vmatprep.subr.bf16.mxu1 %v1552_v0 }
  0xa1   : > { %1406 = vmatprep.subr.msk.bf16.mxu0 %vm212_vm2, %v677_v48  ;;  %v689_v52 = vsel %vm212_vm2, %v678_v49, 0 }
  0xa3   : > { %v790_v53 = vpop.permute.xlu0 %789  ;;  %v792_v54 = vpop.permute.xlu1 %791 }
  0xa4   : > { %v798_v57 = vsel %vm797_vm7, %v790_v53, %v792_v54 }
  0xa5   : > { %1401 = vmatmul.mubr.msk.bf16.vlgmr.msra.gmra.mxu0 %vm208_vm3, %v1538_v50  ;;  %1475 = vmatmul.mubr.msk.bf16.vlgmr.msra.gmra.mxu1 %vm208_vm3, %v1538_v50  ;;  %v805_v61 = vsel %vm212_vm2, %v798_v57, 0 }
  0xa6   : > { %706 = vmatpush1.bf16.msra.mxu0 %v683_v51  ;;  %1479 = vmatpush3.bf16.msra.mxu1 %v689_v52 }
  0xa7   : > { %v794_v55 = vpop.permute.xlu0 %793  ;;  %v796_v56 = vpop.permute.xlu1 %795  ;;  %723 = vmatprep.mubr.bf16.mxu0 %v1553_v1  ;;  %1480 = vmatprep.mubr.msk.bf16.mxu1 %vm1554_vm0, %v1552_v0 }
  0xa8   : > { %v799_v58 = vsel %vm797_vm7, %v792_v54, %v794_v55  ;;  %v800_v59 = vsel %vm797_vm7, %v794_v55, %v796_v56  ;;  %1484 = vmatprep.subr.bf16.mxu1 %v1552_v0 }
  0xa9   : > { %1412 = vmatprep.subr.msk.bf16.mxu0 %vm212_vm2, %v799_v58  ;;  %v811_v62 = vsel %vm212_vm2, %v800_v59, 0 }
  0xab   : > { %v912_v63 = vpop.permute.xlu0 %911  ;;  %v914_v2 = vpop.permute.xlu1 %913 }
  0xac   : > { %v920_v5 = vsel %vm919_vm8, %v912_v63, %v914_v2 }
  0xad   : > { %1407 = vmatmul.mubr.msk.bf16.vlgmr.msra.gmra.mxu0 %vm208_vm3, %v1539_v60  ;;  %1481 = vmatmul.mubr.msk.bf16.vlgmr.msra.gmra.mxu1 %vm208_vm3, %v1539_v60  ;;  %v927_v9 = vsel %vm212_vm2, %v920_v5, 0 }
  0xae   : > { %828 = vmatpush1.bf16.msra.mxu0 %v805_v61  ;;  %1485 = vmatpush3.bf16.msra.mxu1 %v811_v62 }
  0xaf   : > { %v916_v3 = vpop.permute.xlu0 %915  ;;  %v918_v4 = vpop.permute.xlu1 %917  ;;  %845 = vmatprep.mubr.bf16.mxu0 %v1553_v1  ;;  %1486 = vmatprep.mubr.msk.bf16.mxu1 %vm1554_vm0, %v1552_v0 }
  0xb0   : > { %v921_v6 = vsel %vm919_vm8, %v914_v2, %v916_v3  ;;  %v922_v7 = vsel %vm919_vm8, %v916_v3, %v918_v4  ;;  %1490 = vmatprep.subr.bf16.mxu1 %v1552_v0 }
  0xb1   : > { %1418 = vmatprep.subr.msk.bf16.mxu0 %vm212_vm2, %v921_v6  ;;  %v933_v10 = vsel %vm212_vm2, %v922_v7, 0 }
  0xb3   : > { %v1034_v11 = vpop.permute.xlu0 %1033  ;;  %v1036_v12 = vpop.permute.xlu1 %1035 }
  0xb4   : > { %v1042_v15 = vsel %vm1041_vm9, %v1034_v11, %v1036_v12 }
  0xb5   : > { %1413 = vmatmul.mubr.msk.bf16.vlgmr.msra.gmra.mxu0 %vm208_vm3, %v1540_v8  ;;  %1487 = vmatmul.mubr.msk.bf16.vlgmr.msra.gmra.mxu1 %vm208_vm3, %v1540_v8  ;;  %v1049_v19 = vsel %vm212_vm2, %v1042_v15, 0 }
  0xb6   : > { %950 = vmatpush1.bf16.msra.mxu0 %v927_v9  ;;  %1491 = vmatpush3.bf16.msra.mxu1 %v933_v10 }
  0xb7   : > { %v1038_v13 = vpop.permute.xlu0 %1037  ;;  %v1040_v14 = vpop.permute.xlu1 %1039  ;;  %967 = vmatprep.mubr.bf16.mxu0 %v1553_v1  ;;  %1492 = vmatprep.mubr.msk.bf16.mxu1 %vm1554_vm0, %v1552_v0 }
  0xb8   : > { %v1043_v16 = vsel %vm1041_vm9, %v1036_v12, %v1038_v13  ;;  %v1044_v17 = vsel %vm1041_vm9, %v1038_v13, %v1040_v14  ;;  %1496 = vmatprep.subr.bf16.mxu1 %v1552_v0 }
  0xb9   : > { %1424 = vmatprep.subr.msk.bf16.mxu0 %vm212_vm2, %v1043_v16  ;;  %v1055_v20 = vsel %vm212_vm2, %v1044_v17, 0 }
  0xbb   : > { %v1156_v21 = vpop.permute.xlu0 %1155  ;;  %v1158_v22 = vpop.permute.xlu1 %1157 }
  0xbc   : > { %v1164_v25 = vsel %vm1163_vm10, %v1156_v21, %v1158_v22 }
  0xbd   : > { %1419 = vmatmul.mubr.msk.bf16.vlgmr.msra.gmra.mxu0 %vm208_vm3, %v1541_v18  ;;  %1493 = vmatmul.mubr.msk.bf16.vlgmr.msra.gmra.mxu1 %vm208_vm3, %v1541_v18  ;;  %v1171_v29 = vsel %vm212_vm2, %v1164_v25, 0 }
  0xbe   : > { %1072 = vmatpush1.bf16.msra.mxu0 %v1049_v19  ;;  %1497 = vmatpush3.bf16.msra.mxu1 %v1055_v20 }
  0xbf   : > { %v1160_v23 = vpop.permute.xlu0 %1159  ;;  %v1162_v24 = vpop.permute.xlu1 %1161  ;;  %1089 = vmatprep.mubr.bf16.mxu0 %v1553_v1  ;;  %1498 = vmatprep.mubr.msk.bf16.mxu1 %vm1554_vm0, %v1552_v0 }
  0xc0   : > { %v1165_v26 = vsel %vm1163_vm10, %v1158_v22, %v1160_v23  ;;  %v1166_v27 = vsel %vm1163_vm10, %v1160_v23, %v1162_v24  ;;  %1502 = vmatprep.subr.bf16.mxu1 %v1552_v0 }
  0xc1   : > { %1430 = vmatprep.subr.msk.bf16.mxu0 %vm212_vm2, %v1165_v26  ;;  %v1177_v30 = vsel %vm212_vm2, %v1166_v27, 0 }
  0xc5   : > { %1425 = vmatmul.mubr.msk.bf16.vlgmr.msra.gmra.mxu0 %vm208_vm3, %v1542_v28  ;;  %1499 = vmatmul.mubr.msk.bf16.vlgmr.msra.gmra.mxu1 %vm208_vm3, %v1542_v28 }
  0xc6   : > { %1194 = vmatpush1.bf16.msra.mxu0 %v1171_v29  ;;  %1503 = vmatpush3.bf16.msra.mxu1 %v1177_v30 }
  0xc7   : > { %1211 = vmatprep.mubr.bf16.mxu0 %v1553_v1  ;;  %1504 = vmatprep.mubr.msk.bf16.mxu1 %vm1554_vm0, %v1552_v0 }
  0xcd   : > { %1431 = vmatmul.mubr.msk.bf16.vlgmr.msra.gmra.mxu0 %vm208_vm3, %v1543_v31  ;;  %1505 = vmatmul.mubr.msk.bf16.vlgmr.msra.gmra.mxu1 %vm208_vm3, %v1543_v31 }
 0x14d   : > { %v256_v32 = vpop.f32.mrf.mxu0  ;;  %v299_v33 = vpop.f32.mrf.mxu1 }
 0x14f   : > { %v258_v34 = vpop.f32.mrf.mxu0  ;;  %v1458_v35 = vpop.f32.mrf.mxu1 }
 0x151   : > { %v260_v36 = vpop.f32.mrf.mxu0  ;;  %v302_v37 = vpop.f32.mrf.mxu1 }
 0x153   : > { %v262_v38 = vpop.f32.mrf.mxu0  ;;  %v1459_v39 = vpop.f32.mrf.mxu1 }
 0x155   : > { %v365_v1 = vpop.f32.mrf.mxu0  ;;  %v408_v40 = vpop.f32.mrf.mxu1 }
 0x156   : > { %v366_v20 = vadd.f32 %v365_v1, %v256_v32  ;;  %v409_v21 = vadd.f32 %v408_v40, %v299_v33 }
 0x157   : > { %v367_v41 = vpop.f32.mrf.mxu0  ;;  %v1464_v0 = vpop.f32.mrf.mxu1 }
 0x158   : > { %v368_v24 = vadd.f32 %v367_v41, %v258_v34 }
 0x159   : > { %v369_v42 = vpop.f32.mrf.mxu0  ;;  %v411_v43 = vpop.f32.mrf.mxu1 }
 0x15a   : > { %v370_v35 = vadd.f32 %v369_v42, %v260_v36  ;;  %v412_v39 = vadd.f32 %v411_v43, %v302_v37 }
 0x15b   : > { %v371_v44 = vpop.f32.mrf.mxu0  ;;  %v1465_v45 = vpop.f32.mrf.mxu1 }
 0x15c   : > { %v372_v0 = vadd.f32 %v371_v44, %v262_v38 }
 0x15d   : > { %v481_v46 = vpop.f32.mrf.mxu0  ;;  %v524_v47 = vpop.f32.mrf.mxu1 }
 0x15e   : > { %v531_v25 = vadd.f32 %v481_v46, %v366_v20  ;;  %v533_v26 = vadd.f32 %v524_v47, %v409_v21 }
 0x15f   : > { %v483_v48 = vpop.f32.mrf.mxu0  ;;  %v1470_v49 = vpop.f32.mrf.mxu1 }
 0x160   : > { %v532_v29 = vadd.f32 %v483_v48, %v368_v24 }
 0x161   : > { %v485_v50 = vpop.f32.mrf.mxu0  ;;  %v527_v51 = vpop.f32.mrf.mxu1 }
 0x162   : > { %v534_v32 = vadd.f32 %v485_v50, %v370_v35  ;;  %v536_v33 = vadd.f32 %v527_v51, %v412_v39 }
 0x163   : > { %v487_v52 = vpop.f32.mrf.mxu0  ;;  %v1471_v53 = vpop.f32.mrf.mxu1 }
 0x164   : > { %v535_v1 = vadd.f32 %v487_v52, %v372_v0 }
 0x165   : > { %v603_v54 = vpop.f32.mrf.mxu0  ;;  %v646_v55 = vpop.f32.mrf.mxu1 }
 0x166   : > { %v653_v30 = vadd.f32 %v603_v54, %v531_v25  ;;  %v655_v31 = vadd.f32 %v646_v55, %v533_v26 }
 0x167   : > { %v605_v56 = vpop.f32.mrf.mxu0  ;;  %v1476_v57 = vpop.f32.mrf.mxu1 }
 0x168   : > { %v654_v53 = vadd.f32 %v605_v56, %v532_v29 }
 0x169   : > { %v607_v58 = vpop.f32.mrf.mxu0  ;;  %v649_v59 = vpop.f32.mrf.mxu1 }
 0x16a   : > { %v658_v48 = vadd.f32 %v649_v59, %v536_v33 }
 0x16b   : > { %v609_v60 = vpop.f32.mrf.mxu0  ;;  %v1477_v61 = vpop.f32.mrf.mxu1 }
 0x16c   : > { %v657_v54 = vadd.f32 %v609_v60, %v535_v1 }
 0x16d   : > { %v725_v62 = vpop.f32.mrf.mxu0  ;;  %v768_v63 = vpop.f32.mrf.mxu1 }
 0x16e   : > { %v775_v57 = vadd.f32 %v725_v62, %v653_v30  ;;  %v777_v61 = vadd.f32 %v768_v63, %v655_v31 }
 0x16f   : > { %v727_v2 = vpop.f32.mrf.mxu0  ;;  %v1482_v3 = vpop.f32.mrf.mxu1 }
 0x170   : > { %v776_v41 = vadd.f32 %v727_v2, %v654_v53  ;;  %v656_v3 = vadd.f32 %v607_v58, %v534_v32  ;;  %v1274_v2 = vpop.permute.xlu0 %1273 }
 0x171   : > { %v729_v4 = vpop.f32.mrf.mxu0  ;;  %v771_v5 = vpop.f32.mrf.mxu1 }
 0x172   : > { %v778_v43 = vadd.f32 %v729_v4, %v656_v3  ;;  %v780_v44 = vadd.f32 %v771_v5, %v658_v48 }
 0x173   : > { %v731_v6 = vpop.f32.mrf.mxu0  ;;  %v1483_v7 = vpop.f32.mrf.mxu1 }
 0x174   : > { %v779_v56 = vadd.f32 %v731_v6, %v657_v54 }
 0x175   : > { %v847_v8 = vpop.f32.mrf.mxu0  ;;  %v890_v9 = vpop.f32.mrf.mxu1 }
 0x176   : > { %v897_v46 = vadd.f32 %v847_v8, %v775_v57  ;;  %v899_v47 = vadd.f32 %v890_v9, %v777_v61 }
 0x177   : > { %v849_v10 = vpop.f32.mrf.mxu0  ;;  %v1488_v11 = vpop.f32.mrf.mxu1 }
 0x178   : > { %v898_v37 = vadd.f32 %v849_v10, %v776_v41 }
 0x179   : > { %v851_v12 = vpop.f32.mrf.mxu0  ;;  %v893_v13 = vpop.f32.mrf.mxu1 }
 0x17a   : > { %v900_v7 = vadd.f32 %v851_v12, %v778_v43  ;;  %v902_v8 = vadd.f32 %v893_v13, %v780_v44 }
 0x17b   : > { %v853_v14 = vpop.f32.mrf.mxu0  ;;  %v1489_v15 = vpop.f32.mrf.mxu1 }
 0x17c   : > { %v901_v58 = vadd.f32 %v853_v14, %v779_v56 }
 0x17d   : > { %v969_v16 = vpop.f32.mrf.mxu0  ;;  %v1012_v17 = vpop.f32.mrf.mxu1 }
 0x17e   : > { %v1019_v38 = vadd.f32 %v969_v16, %v897_v46  ;;  %v1021_v42 = vadd.f32 %v1012_v17, %v899_v47 }
 0x17f   : > { %v971_v18 = vpop.f32.mrf.mxu0  ;;  %v1494_v19 = vpop.f32.mrf.mxu1 }
 0x180   : > { %v1020_v52 = vadd.f32 %v971_v18, %v898_v37 }
 0x181   : > { %v973_v22 = vpop.f32.mrf.mxu0  ;;  %v1015_v23 = vpop.f32.mrf.mxu1 }
 0x182   : > { %v1022_v15 = vadd.f32 %v973_v22, %v900_v7  ;;  %v1024_v4 = vadd.f32 %v1015_v23, %v902_v8  ;;  %v1279_v23 = vpop.permute.xlu1 %1278 }
 0x183   : > { %v975_v27 = vpop.f32.mrf.mxu0  ;;  %v1495_v28 = vpop.f32.mrf.mxu1 }
 0x184   : > { %v1023_v5 = vadd.f32 %v975_v27, %v901_v58 }
 0x185   : > { %v1091_v45 = vpop.f32.mrf.mxu0  ;;  %v1134_v49 = vpop.f32.mrf.mxu1 }
 0x186   : > { %v1141_v62 = vadd.f32 %v1091_v45, %v1019_v38  ;;  %v1143_v63 = vadd.f32 %v1134_v49, %v1021_v42 }
 0x187   : > { %v1093_v40 = vpop.f32.mrf.mxu0  ;;  %v1500_v34 = vpop.f32.mrf.mxu1 }
 0x188   : > { %v1142_v9 = vadd.f32 %v1093_v40, %v1020_v52 }
 0x189   : > { %v1095_v55 = vpop.f32.mrf.mxu0  ;;  %v1137_v36 = vpop.f32.mrf.mxu1 }
 0x18a   : > { %v1144_v20 = vadd.f32 %v1095_v55, %v1022_v15  ;;  %v1146_v21 = vadd.f32 %v1137_v36, %v1024_v4 }
 0x18b   : > { %v1097_v50 = vpop.f32.mrf.mxu0  ;;  %v1501_v51 = vpop.f32.mrf.mxu1 }
 0x18c   : > { %v1145_v24 = vadd.f32 %v1097_v50, %v1023_v5 }
 0x18d   : > { %v1213_v59 = vpop.f32.mrf.mxu0  ;;  %v1256_v60 = vpop.f32.mrf.mxu1 }
 0x18e   : > { %v1263_v11 = vadd.f32 %v1213_v59, %v1141_v62  ;;  %v1265_v10 = vadd.f32 %v1256_v60, %v1143_v63 }
 0x18f   : > { %v1215_v16 = vpop.f32.mrf.mxu0  ;;  %v1506_v6 = vpop.f32.mrf.mxu1 }
 0x190   : > { %v1281_v17 = vadd.f32 %v1274_v2, %v1263_v11  ;;  %v1283_v19 = vadd.f32 %v1274_v2, %v1265_v10  ;;  %v1264_v18 = vadd.f32 %v1215_v16, %v1142_v9 }
 0x191   : > { %v1217_v12 = vpop.f32.mrf.mxu0  ;;  %v1259_v13 = vpop.f32.mrf.mxu1 }
 0x192   : > { %vm1287_vm11 = vcmp.gt.f32.partialorder %v1281_v17, 0.0  ;;  %vm1289_vm12 = vcmp.gt.f32.partialorder %v1283_v19, 0.0  ;;  %v1293_v14 = vmul.f32 0.2, %v1281_v17  ;;  %v1295_v22 = vmul.f32 0.2, %v1283_v19 }
 0x193   : > { %v1282_v25 = vadd.f32 %v1274_v2, %v1264_v18  ;;  %v1266_v26 = vadd.f32 %v1217_v12, %v1144_v20  ;;  %v1268_v27 = vadd.f32 %v1259_v13, %v1146_v21  ;;  %v1219_v28 = vpop.f32.mrf.mxu0  ;;  %v1507_v29 = vpop.f32.mrf.mxu1 }
 0x194   : > { %v1299_v30 = vsel %vm1287_vm11, %v1281_v17, %v1293_v14  ;;  %v1301_v31 = vsel %vm1289_vm12, %v1283_v19, %v1295_v22  ;;  %v1267_v35 = vadd.f32 %v1219_v28, %v1145_v24 }
 0x195   : > { %1305 = vst [vmem:[%s1733_s26] sm:$0xff] %v1299_v30  ;;  %1307 = vst [vmem:[%s1733_s26 + $0x10] sm:$0xff] %v1301_v31  ;;  %vm1288_vm13 = vcmp.gt.f32.partialorder %v1282_v25, 0.0  ;;  %v1294_v39 = vmul.f32 0.2, %v1282_v25  ;;  %v1284_v0 = vadd.f32 %v1279_v23, %v1266_v26  ;;  %v1286_v45 = vadd.f32 %v1279_v23, %v1268_v27 }
 0x196   : > { %v1285_v49 = vadd.f32 %v1279_v23, %v1267_v35 }
 0x197   : > { %v1300_v53 = vsel %vm1288_vm13, %v1282_v25, %v1294_v39  ;;  %vm1290_vm14 = vcmp.gt.f32.partialorder %v1284_v0, 0.0  ;;  %vm1292_vm15 = vcmp.gt.f32.partialorder %v1286_v45, 0.0  ;;  %v1296_v57 = vmul.f32 0.2, %v1284_v0 }
 0x198   : > { %1306 = vst [vmem:[%s1733_s26 + $0x8] sm:$0xff] %v1300_v53  ;;  %v1298_v61 = vmul.f32 0.2, %v1286_v45  ;;  %vm1291_vm0 = vcmp.gt.f32.partialorder %v1285_v49, 0.0  ;;  %v1297_v32 = vmul.f32 0.2, %v1285_v49 }
 0x199   : > { %v1302_v33 = vsel %vm1290_vm14, %v1284_v0, %v1296_v57 }
 0x19a   : > { %v1304_v1 = vsel %vm1292_vm15, %v1286_v45, %v1298_v61  ;;  %1308 = vst [vmem:[%s1733_s26 + $0x18] sm:$0xff] %v1302_v33  ;;  %v1303_v40 = vsel %vm1291_vm0, %v1285_v49, %v1297_v32 }
 0x19b   : > { %1310 = vst [vmem:[%s1733_s26 + $0x28] sm:$0xff] %v1304_v1  ;;  %1309 = vst [vmem:[%s1733_s26 + $0x20] sm:$0xff] %v1303_v40 }
 0x19c PF: > { %s13_s12 = sadd.s32 1, %s1550_s12  }
 0x19d   : > { %p10_p4 = scmp.ge.s32.totalorder %s13_s12, 4  }
 0x19f   :  { %12 = sbr.rel (!%p10_p4) target bundleno = 1 (0x1), region = 70 }

// kernel: encoder_forward.6
= control target key start
LH: loop header
LB: loop body
LE: loop exit
PB: predicated region body
PF: predicated region fallthrough
CT: control target
= control target key end

     0   :  { %s1978_s21 = smov 0   ;;  %s2240_s0 = inlined_call_operand.vmem [shape: bf16[2,16,256], index: 0, kind: input, shape index: {}]   ;;  %s2241_s1 = inlined_call_operand.vmem [shape: s32[1,256], index: 1, kind: input, shape index: {}]   ;;  %s2242_s2 = inlined_call_operand.vmem [shape: bf16[9,16,16], index: 2, kind: input, shape index: {}]   ;;  %s2243_s3 = inlined_call_operand.vmem [shape: f32[16,1], index: 3, kind: input, shape index: {}]   ;;  %s2244_s4 = inlined_call_operand.vmem [shape: bf16[9,16,16], index: 4, kind: input, shape index: {}]   ;;  %s2245_s5 = inlined_call_operand.vmem [shape: f32[16,1], index: 5, kind: input, shape index: {}]   ;;  %s2246_s6 = inlined_call_operand.vmem [shape: f32[2,16,128], index: 6, kind: output, shape index: {}]  }
   0x1 LB: > { %s1627_s22 = sadd.s32 4294967295, %s1927_s21   ;;  %p1631_p0 = scmp.ge.s32.totalorder %s1927_s21, 1  ;;  %s1927_s21 = sphi %s1978_s21, %s16_s21  }
   0x2   : > { %p212_p1 = scmp.lt.s32.totalorder %s1927_s21, 3 }
   0x4   : > { %p213_p2 = pnand %p1631_p0, %p212_p1 }
   0x5   : > { %p242_p3 = scmp.lt.s32.totalorder (!%p213_p2), %s1627_s22, 1  ;;  %s1931_s27 = smov (!%p213_p2), 127  }
   0x6   : > { %216 = sbr.rel (%p213_p2) target bundleno = 1594 (0x63a), region = 44  ;;  %s1932_s28 = smov (!%p213_p2), 126  }
   0x7   : > { %s1933_s7 = smov (!%p213_p2), 118   ;;  %s1934_s8 = smov (!%p213_p2), 117  }
   0x8   : > { %s1935_s9 = smov (!%p213_p2), 116   ;;  %s1936_s10 = smov (!%p213_p2), 108  }
   0x9   : > { %s1937_s11 = smov (!%p213_p2), 107   ;;  %s1938_s12 = smov (!%p213_p2), 106  }
   0xa   : > { %s1940_s20 = smov (!%p213_p2), 11   ;;  %s1942_s29 = smov (!%p213_p2), 2  }
   0xb   : > { %v1929_v0 = vmov 0.0   ;;  %s2252_s22 = smov (!%p242_p3, %s1627_s22), 1  ;;  %vm1930_vm0 = vmmov 0   ;;  %vm284_vm1 = vcmask 130048   ;;  %v1900_v6 = vld [vmem:[%s2242_s2] sm:$0xff]   ;;  %v1939_v7 = vmov 0  }
   0xc   : > { %1754 = vmatprep.subr.bf16.mxu0 %v1929_v0  ;;  %1760 = vmatprep.subr.bf16.mxu1 %v1929_v0  ;;  %s1714_s23 = sshll.u32 %s2252_s22, 4  ;;  %827 = vst [vmem:[#allocation2] sm:$0xff] %v1939_v7  ;;  %828 = vst [vmem:[#allocation2 + $0x8] sm:$0xff] %v1939_v7  ;;  %v811_v8 = vld [vmem:[%s2243_s3] sm:$0xff]  ;;  %v812_v9 = vld [vmem:[%s2243_s3 + $0x8] sm:$0xff]  ;;  %vm281_vm2 = vcmask 1039360  }
   0xd   : > { %1756 = vmatprep.mubr.msk.bf16.mxu0 %vm1930_vm0, %v1929_v0  ;;  %1762 = vmatprep.mubr.msk.bf16.mxu1 %vm1930_vm0, %v1929_v0  ;;  %s246_s26 = scalar_lea.vmem %s2240_s0, %s1714_s23  ;;  %vm396_vm3 = vcmask 1031168   ;;  %v1899_v15 = vld [vmem:[%s2242_s2 + $0x8] sm:$0xff]   ;;  %vm457_vm4 = vcmask 965632   ;;  %v1902_v20 = vld [vmem:[%s2242_s2 + $0x18] sm:$0xff]   ;;  %vm518_vm5 = vcmask 957440   ;;  %v1901_v23 = vld [vmem:[%s2242_s2 + $0x10] sm:$0xff]  }
   0xe   : > { %v2000_v1 = vld [vmem:[%s246_s26] sm:$0xff]  ;;  %v2002_v2 = vld [vmem:[%s246_s26 + $0x8] sm:$0xff]  ;;  %1884 = vset.pattern.permute.xlu0 %v1939_v7  ;;  %1885 = vset.pattern.permute.xlu1 %v1939_v7  ;;  %vm579_vm6 = vcmask 949248   ;;  %vm640_vm7 = vcmask 883712   ;;  %vm2248_vm8 = vcmask 875520   ;;  %v1906_v36 = vld [vmem:[%s2242_s2 + $0x38] sm:$0xff]  }
   0xf   : > { %v1639_v3 = vcombine.low %v2000_v1, %v2002_v2  ;;  %v1898_v4 = vld [vmem:[%s246_s26] ss:$8 sps:$4 sm:$0xff]   ;;  %v1640_v5 = vcombine.high %v2000_v1, %v2002_v2  ;;  %vm2247_vm9 = vcmask 867328   ;;  %v1905_v39 = vld [vmem:[%s2242_s2 + $0x30] sm:$0xff]   ;;  %vm846_vm10 = vcmask 1043544   ;;  %s1941_s26 = smov 20  }
  0x10   : > { %1761 = vmatpush3.bf16.msra.mxu1 %v1898_v4  ;;  %v1904_v28 = vld [vmem:[%s2242_s2 + $0x28] sm:$0xff]   ;;  %v1903_v31 = vld [vmem:[%s2242_s2 + $0x20] sm:$0xff]   ;;  %vm847_vm11 = vcmask 89092   ;;  %vm841_vm12 = vcmask 89088   ;;  %vm861_vm15 = vcmask 76800  }
  0x11   : > { %277 = vrot.lane.b32.xlu0 %v1639_v3, %s1931_s27  ;;  %392 = vrot.lane.b32.xlu1 %v1639_v3, %s1932_s28  ;;  %v1907_v41 = vld [vmem:[%s2242_s2 + $0x40] sm:$0xff]   ;;  %vm848_vm13 = vmor %vm847_vm11, %vm846_vm10 }
  0x12   : > { %1772 = vmatprep.subr.bf16.mxu1 %v1929_v0 }
  0x13   : > { %1763 = vmatmul.mubr.msk.bf16.vlgmr.msra.gmra.mxu1 %vm284_vm1, %v1900_v6 }
  0x14   : > { %1774 = vmatprep.mubr.msk.bf16.mxu1 %vm1930_vm0, %v1929_v0 }
  0x15   : > { %279 = vrot.lane.b32.xlu0 %v1640_v5, %s1931_s27  ;;  %394 = vrot.lane.b32.xlu1 %v1640_v5, %s1932_s28 }
  0x19   : > { %455 = vrot.lane.b32.xlu1 %v1640_v5, %s1933_s7  ;;  %453 = vrot.lane.b32.xlu0 %v1639_v3, %s1933_s7 }
  0x1d   : > { %516 = vrot.lane.b32.xlu1 %v1640_v5, %s1934_s8  ;;  %514 = vrot.lane.b32.xlu0 %v1639_v3, %s1934_s8 }
  0x21   : > { %577 = vrot.lane.b32.xlu1 %v1640_v5, %s1935_s9  ;;  %575 = vrot.lane.b32.xlu0 %v1639_v3, %s1935_s9 }
  0x25   : > { %638 = vrot.lane.b32.xlu1 %v1640_v5, %s1936_s10  ;;  %636 = vrot.lane.b32.xlu0 %v1639_v3, %s1936_s10 }
  0x29   : > { %699 = vrot.lane.b32.xlu1 %v1640_v5, %s1937_s11  ;;  %697 = vrot.lane.b32.xlu0 %v1639_v3, %s1937_s11 }
  0x2d   : > { %760 = vrot.lane.b32.xlu1 %v1640_v5, %s1938_s12  ;;  %758 = vrot.lane.b32.xlu0 %v1639_v3, %s1938_s12 }
  0x31   : > { %815 = vperm.xlu0 %1884, %v811_v8   ;;  %820 = vperm.xlu1 %1885, %v812_v9  }
  0x83   : > { %v278_v10 = vpop.permute.xlu0 %277  ;;  %v393_v11 = vpop.permute.xlu1 %392 }
  0x87   : > { %v280_v12 = vpop.permute.xlu0 %279  ;;  %v395_v13 = vpop.permute.xlu1 %394 }
  0x88   : > { %v282_v14 = vsel %vm281_vm2, %v278_v10, %v280_v12  ;;  %v397_v16 = vsel %vm396_vm3, %v393_v11, %v395_v13 }
  0x89   : > { %1755 = vmatpush3.bf16.msra.mxu0 %v282_v14 }
  0x8a   : > { %1766 = vmatprep.subr.bf16.mxu0 %v1929_v0 }
  0x8b   : > { %v456_v17 = vpop.permute.xlu1 %455  ;;  %v454_v18 = vpop.permute.xlu0 %453 }
  0x8c   : > { %1757 = vmatmul.mubr.msk.bf16.vlgmr.msra.gmra.mxu0 %vm284_vm1, %v1899_v15  ;;  %v458_v19 = vsel %vm457_vm4, %v454_v18, %v456_v17 }
  0x8d   : > { %1767 = vmatpush3.bf16.msra.mxu0 %v397_v16  ;;  %1773 = vmatpush3.bf16.msra.mxu1 %v458_v19 }
  0x8e   : > { %1768 = vmatprep.mubr.msk.bf16.mxu0 %vm1930_vm0, %v1929_v0  ;;  %1778 = vmatprep.subr.bf16.mxu0 %v1929_v0 }
  0x8f   : > { %v517_v21 = vpop.permute.xlu1 %516  ;;  %v515_v22 = vpop.permute.xlu0 %514  ;;  %1784 = vmatprep.subr.bf16.mxu1 %v1929_v0 }
  0x90   : > { %1775 = vmatmul.mubr.msk.bf16.vlgmr.msra.gmra.mxu1 %vm284_vm1, %v1902_v20  ;;  %v519_v24 = vsel %vm518_vm5, %v515_v22, %v517_v21 }
  0x91   : > { %1786 = vmatprep.mubr.msk.bf16.mxu1 %vm1930_vm0, %v1929_v0 }
  0x93   : > { %v578_v25 = vpop.permute.xlu1 %577  ;;  %v576_v26 = vpop.permute.xlu0 %575 }
  0x94   : > { %1769 = vmatmul.mubr.msk.bf16.vlgmr.msra.gmra.mxu0 %vm284_vm1, %v1901_v23  ;;  %v580_v27 = vsel %vm579_vm6, %v576_v26, %v578_v25 }
  0x95   : > { %1779 = vmatpush3.bf16.msra.mxu0 %v519_v24  ;;  %1785 = vmatpush3.bf16.msra.mxu1 %v580_v27 }
  0x96   : > { %1780 = vmatprep.mubr.msk.bf16.mxu0 %vm1930_vm0, %v1929_v0  ;;  %1790 = vmatprep.subr.bf16.mxu0 %v1929_v0 }
  0x97   : > { %v639_v29 = vpop.permute.xlu1 %638  ;;  %v637_v30 = vpop.permute.xlu0 %636  ;;  %1796 = vmatprep.subr.bf16.mxu1 %v1929_v0 }
  0x98   : > { %1787 = vmatmul.mubr.msk.bf16.vlgmr.msra.gmra.mxu1 %vm284_vm1, %v1904_v28  ;;  %v641_v32 = vsel %vm640_vm7, %v637_v30, %v639_v29 }
  0x99   : > { %1798 = vmatprep.mubr.msk.bf16.mxu1 %vm1930_vm0, %v1929_v0 }
  0x9b   : > { %v700_v33 = vpop.permute.xlu1 %699  ;;  %v698_v34 = vpop.permute.xlu0 %697 }
  0x9c   : > { %1781 = vmatmul.mubr.msk.bf16.vlgmr.msra.gmra.mxu0 %vm284_vm1, %v1903_v31  ;;  %v702_v35 = vsel %vm2248_vm8, %v698_v34, %v700_v33 }
  0x9d   : > { %1791 = vmatpush3.bf16.msra.mxu0 %v641_v32  ;;  %1797 = vmatpush3.bf16.msra.mxu1 %v702_v35 }
  0x9e   : > { %1792 = vmatprep.mubr.msk.bf16.mxu0 %vm1930_vm0, %v1929_v0  ;;  %1802 = vmatprep.subr.bf16.mxu0 %v1929_v0 }
  0x9f   : > { %v761_v37 = vpop.permute.xlu1 %760  ;;  %v759_v38 = vpop.permute.xlu0 %758  ;;  %1808 = vmatprep.subr.bf16.mxu1 %v1929_v0 }
  0xa0   : > { %1799 = vmatmul.mubr.msk.bf16.vlgmr.msra.gmra.mxu1 %vm284_vm1, %v1906_v36  ;;  %v763_v40 = vsel %vm2247_vm9, %v759_v38, %v761_v37  ;;  %vm927_vm9 = vcmask 1031172  }
  0xa1   : > { %1810 = vmatprep.mubr.msk.bf16.mxu1 %vm1930_vm0, %v1929_v0 }
  0xa4   : > { %1793 = vmatmul.mubr.msk.bf16.vlgmr.msra.gmra.mxu0 %vm284_vm1, %v1905_v39 }
  0xa5   : > { %1803 = vmatpush3.bf16.msra.mxu0 %v763_v40  ;;  %1804 = vmatprep.mubr.msk.bf16.mxu0 %vm1930_vm0, %v1929_v0 }
  0xa6   : > { %1814 = vmatprep.subr.bf16.mxu0 %v1929_v0 }
  0xac   : > { %1805 = vmatmul.mubr.msk.bf16.vlgmr.msra.gmra.mxu0 %vm284_vm1, %v1907_v41  ;;  %v816_v28 = vpop.permute.xlu0 %815  ;;  %v821_v34 = vpop.permute.xlu1 %820 }
  0xad   : > { %1816 = vmatprep.mubr.msk.bf16.mxu0 %vm1930_vm0, %v1929_v0 }
  0xd3   : > { %v377_v42 = vpop.f32.mrf.mxu1 }
  0xd5   : > { %v1764_v43 = vpop.f32.mrf.mxu1 }
  0xd7   : > { %v380_v44 = vpop.f32.mrf.mxu1 }
  0xd9   : > { %v1765_v45 = vpop.f32.mrf.mxu1 }
 0x14c   : > { %v322_v46 = vpop.f32.mrf.mxu0 }
 0x14d   : > { %v378_v58 = vadd.f32 %v377_v42, %v322_v46 }
 0x14e   : > { %v1758_v47 = vpop.f32.mrf.mxu0 }
 0x150   : > { %v325_v48 = vpop.f32.mrf.mxu0  ;;  %v497_v49 = vpop.f32.mrf.mxu1 }
 0x151   : > { %v381_v3 = vadd.f32 %v380_v44, %v325_v48 }
 0x152   : > { %v1759_v50 = vpop.f32.mrf.mxu0  ;;  %v1776_v51 = vpop.f32.mrf.mxu1 }
 0x153   : > { %v882_v50 = vlaneseq }
 0x154   : > { %v436_v52 = vpop.f32.mrf.mxu0  ;;  %v500_v53 = vpop.f32.mrf.mxu1 }
 0x155   : > { %v443_v61 = vadd.f32 %v436_v52, %v378_v58  ;;  %v883_v51 = vshrl.u32 %v882_v50, 7  ;;  %v879_v52 = vld [vmem:[%s2241_s1] sm:$0x3] }
 0x156   : > { %v1770_v54 = vpop.f32.mrf.mxu0  ;;  %v1777_v55 = vpop.f32.mrf.mxu1  ;;  %vm880_vm14 = vcmp.eq.s32.totalorder %v879_v52, 0  ;;  %v1913_v50 = vld [vmem:[%s2244_s4] sm:$0xff]   ;;  %v1548_v52 = vunpack.c.h.bf16 %v2000_v1 }
 0x157   : > { %v504_v6 = vadd.f32 %v497_v49, %v443_v61  ;;  %v888_v54 = vsub.s32 1, %v883_v51  ;;  %v881_v55 = vsel %vm880_vm14, 1, %v1939_v7 }
 0x158   : > { %v439_v56 = vpop.f32.mrf.mxu0  ;;  %v619_v57 = vpop.f32.mrf.mxu1 }
 0x159   : > { %v444_v8 = vadd.f32 %v439_v56, %v381_v3  ;;  %v889_v58 = vrot.slane %v881_v55, %v888_v54 }
 0x15a   : > { %v1771_v59 = vpop.f32.mrf.mxu0  ;;  %v1788_v60 = vpop.f32.mrf.mxu1 }
 0x15b   : > { %v505_v14 = vadd.f32 %v500_v53, %v444_v8  ;;  %v884_v53 = vsub.s32 0, %v883_v51  ;;  %vm891_vm11 = vcmp.eq.s32.totalorder %v889_v58, 1  ;;  %v933_v8 = vld [vmem:[%s2241_s1] sm:$0x3]  ;;  %v1547_v51 = vunpack.c.l.bf16 %v2000_v1 }
 0x15c   : > { %v558_v62 = vpop.f32.mrf.mxu0  ;;  %v622_v63 = vpop.f32.mrf.mxu1  ;;  %vm934_vm14 = vcmp.eq.s32.totalorder %v933_v8, 9  ;;  %v1915_v8 = vld [vmem:[%s2244_s4 + $0x18] sm:$0xff]  }
 0x15d   : > { %v565_v11 = vadd.f32 %v558_v62, %v504_v6 }
 0x15e   : > { %v1782_v4 = vpop.f32.mrf.mxu0  ;;  %v1789_v5 = vpop.f32.mrf.mxu1 }
 0x15f   : > { %v626_v17 = vadd.f32 %v619_v57, %v565_v11  ;;  %v885_v57 = vrot.slane %v881_v55, %v884_v53  ;;  %v1532_v55 = vld [vmem:[%s2245_s5 + $0x8] sm:$0xff] }
 0x160   : > { %v561_v9 = vpop.f32.mrf.mxu0  ;;  %v741_v10 = vpop.f32.mrf.mxu1 }
 0x161   : > { %v566_v18 = vadd.f32 %v561_v9, %v505_v14  ;;  %vm890_vm10 = vcmp.eq.s32.totalorder %v885_v57, 1  ;;  %v1886_v57 = vpack.i.bf16 %v1548_v52, %v1547_v51 }
 0x162   : > { %v1783_v12 = vpop.f32.mrf.mxu0  ;;  %v1800_v13 = vpop.f32.mrf.mxu1 }
 0x163   : > { %v627_v23 = vadd.f32 %v622_v63, %v566_v18 }
 0x164   : > { %v680_v15 = vpop.f32.mrf.mxu0  ;;  %v744_v16 = vpop.f32.mrf.mxu1 }
 0x165   : > { %v687_v21 = vadd.f32 %v680_v15, %v626_v17 }
 0x166   : > { %v1794_v19 = vpop.f32.mrf.mxu0  ;;  %v1801_v20 = vpop.f32.mrf.mxu1 }
 0x167   : > { %v748_v25 = vadd.f32 %v741_v10, %v687_v21  ;;  %v935_v10 = vsel %vm934_vm14, 1, %v1939_v7  ;;  %vm926_vm14 = vcmask 1043456  }
 0x168   : > { %v683_v22 = vpop.f32.mrf.mxu0  ;;  %v939_v11 = vrot.slane %v935_v10, %v884_v53  ;;  %v943_v12 = vrot.slane %v935_v10, %v888_v54  ;;  %vm928_vm8 = vmor %vm927_vm9, %vm926_vm14  ;;  %v1549_v53 = vunpack.c.l.bf16 %v2002_v2  ;;  %v1550_v54 = vunpack.c.h.bf16 %v2002_v2 }
 0x169   : > { %v688_v26 = vadd.f32 %v683_v22, %v627_v23 }
 0x16a   : > { %v1795_v24 = vpop.f32.mrf.mxu0  ;;  %v1891_v58 = vpack.i.bf16 %v1550_v54, %v1549_v53 }
 0x16b   : > { %v749_v31 = vadd.f32 %v744_v16, %v688_v26 }
 0x16c   : > { %v802_v27 = vpop.f32.mrf.mxu0 }
 0x16d   : > { %v809_v29 = vadd.f32 %v802_v27, %v748_v25 }
 0x16e   : > { %v1806_v30 = vpop.f32.mrf.mxu0 }
 0x16f   : > { %v823_v32 = vadd.f32 %v816_v28, %v809_v29 }
 0x170   : > { %v805_v33 = vpop.f32.mrf.mxu0 }
 0x171   : > { %v825_v35 = vmax.f32 %v823_v32, 0.0  ;;  %v810_v36 = vadd.f32 %v805_v33, %v749_v31 }
 0x172   : > { %v1807_v37 = vpop.f32.mrf.mxu0 }
 0x173   : > { %v1716_v38 = vpack.c.bf16 %v825_v35, %v825_v35  ;;  %v824_v39 = vadd.f32 %v821_v34, %v810_v36 }
 0x175   : > { %v826_v40 = vmax.f32 %v824_v39, 0.0  ;;  %835 = vrot.lane.b32.xlu1 %v1716_v38, %s1940_s20 }
 0x177   : > { %v1717_v41 = vpack.c.bf16 %v826_v40, %v826_v40 }
 0x179   : > { %837 = vrot.lane.b32.xlu0 %v1717_v41, %s1940_s20 }
 0x1e7   : > { %v836_v42 = vpop.permute.xlu1 %835 }
 0x1e8   : > { %v839_v43 = vrot.slane %v836_v42, 4 }
 0x1ea   : > { %v842_v44 = vsel %vm841_vm12, %v839_v43, %v836_v42 }
 0x1eb   : > { %849 = vst.msk [vmem:[#allocation2] sm:$0xff] %vm848_vm13, %v842_v44  ;;  %v838_v45 = vpop.permute.xlu0 %837 }
 0x1ec   : > { %v840_v46 = vrot.slane %v838_v45, 4 }
 0x1ee   : > { %v843_v47 = vsel %vm841_vm12, %v840_v46, %v838_v45  ;;  %vm892_vm12 = vmpackc.low %vm891_vm11, %vm890_vm10  ;;  %vm944_vm10 = vcmp.eq.s32.totalorder %v939_v11, 1  ;;  %vm945_vm11 = vcmp.eq.s32.totalorder %v943_v12, 1 }
 0x1ef   : > { %850 = vst.msk [vmem:[#allocation2 + $0x8] sm:$0xff] %vm848_vm13, %v843_v47  ;;  %v893_v61 = vsel %vm892_vm12, 65537, %v1939_v7  ;;  %vm874_vm13 = vcmask 814800  }
 0x1f2   : > { %v851_v48 = vld [vmem:[#allocation2] sm:$0xf] }
 0x1f3   : > { %855 = vrot.lane.b32.xlu1 %v851_v48, %s1936_s10 }
 0x1f6   : > { %v852_v49 = vld [vmem:[#allocation2 + $0x8] sm:$0xf] }
 0x1f7   : > { %857 = vrot.lane.b32.xlu0 %v852_v49, %s1936_s10 }
 0x265   : > { %v856_v56 = vpop.permute.xlu1 %855 }
 0x266   : > { %862 = vst.msk [vmem:[#allocation2] sm:$0xf] %vm861_vm15, %v856_v56  ;;  %v1531_v56 = vld [vmem:[%s2245_s5] sm:$0xff] }
 0x269   : > { %v858_v59 = vpop.permute.xlu0 %857 }
 0x26a   : > { %863 = vst.msk [vmem:[#allocation2 + $0x8] sm:$0xf] %vm861_vm15, %v858_v59  ;;  %vm897_vm15 = vcmask 15360  }
 0x26d   : > { %v864_v60 = vld [vmem:[#allocation2] sm:$0xf] }
 0x26e   : > { %868 = vrot.lane.b32.xlu1 %v864_v60, %s1941_s26  ;;  %v1912_v60 = vld [vmem:[%s2244_s4 + $0x8] sm:$0xff]  }
 0x271   : > { %v865_v62 = vld [vmem:[#allocation2 + $0x8] sm:$0xf] }
 0x272   : > { %870 = vrot.lane.b32.xlu0 %v865_v62, %s1941_s26  ;;  %894 = vrot.lane.b32.xlu1 %v893_v61, %s1942_s29 }
 0x2e0   : > { %v869_v63 = vpop.permute.xlu1 %868 }
 0x2e1   : > { %875 = vst.msk [vmem:[#allocation2] sm:$0xf] %vm874_vm13, %v869_v63 }
 0x2e4   : > { %v871_v3 = vpop.permute.xlu0 %870  ;;  %v895_v6 = vpop.permute.xlu1 %894 }
 0x2e5   : > { %876 = vst.msk [vmem:[#allocation2 + $0x8] sm:$0xf] %vm874_vm13, %v871_v3  ;;  %v896_v9 = vrot.slane %v895_v6, 4  ;;  %vm946_vm13 = vmpackc.low %vm945_vm11, %vm944_vm10  ;;  %vm980_vm10 = vcmask 1047556  }
 0x2e6   : > { %v947_v20 = vsel %vm946_vm13, 65537, %v1939_v7 }
 0x2e7   : > { %v898_v13 = vsel %vm897_vm15, %v896_v9, %v895_v6  ;;  %v1914_v6 = vld [vmem:[%s2244_s4 + $0x10] sm:$0xff]  }
 0x2e8   : > { %v877_v4 = vld [vmem:[#allocation2] sm:$0xff]  ;;  %vm899_vm12 = vcmp.ne.s16.totalorder %v898_v13, 0 }
 0x2e9   : > { %902 = vrot.lane.b32.xlu0 %v877_v4, %s1942_s29 }
 0x2ec   : > { %v878_v5 = vld [vmem:[#allocation2 + $0x8] sm:$0xff] }
 0x2ed   : > { %904 = vrot.lane.b32.xlu1 %v878_v5, %s1942_s29 }
 0x35b   : > { %v903_v14 = vpop.permute.xlu0 %902 }
 0x35c   : > { %v906_v15 = vrot.slane %v903_v14, 4 }
 0x35e   : > { %v908_v16 = vsel %vm897_vm15, %v906_v15, %v903_v14  ;;  %v1916_v15 = vld [vmem:[%s2244_s4 + $0x20] sm:$0xff]  }
 0x35f   : > { %v905_v17 = vpop.permute.xlu1 %904  ;;  %v912_v18 = vsel %vm899_vm12, %v877_v4, %v908_v16  ;;  %v1917_v16 = vld [vmem:[%s2244_s4 + $0x28] sm:$0xff]  }
 0x360   : > { %v907_v19 = vrot.slane %v905_v17, 4  ;;  %916 = vrot.lane.b32.xlu0 %v912_v18, %s1932_s28 }
 0x362   : > { %v909_v21 = vsel %vm897_vm15, %v907_v19, %v905_v17 }
 0x363   : > { %v913_v22 = vsel %vm899_vm12, %v878_v5, %v909_v21 }
 0x364   : > { %918 = vrot.lane.b32.xlu1 %v913_v22, %s1932_s28  ;;  %948 = vrot.lane.b32.xlu0 %v947_v20, %s1932_s28 }
 0x3d2   : > { %v917_v23 = vpop.permute.xlu0 %916 }
 0x3d3   : > { %v920_v24 = vrot.slane %v917_v23, 4 }
 0x3d5   : > { %v922_v25 = vsel %vm396_vm3, %v917_v23, %v920_v24  ;;  %v1918_v23 = vld [vmem:[%s2244_s4 + $0x30] sm:$0xff]   ;;  %v1919_v24 = vld [vmem:[%s2244_s4 + $0x38] sm:$0xff]  }
 0x3d6   : > { %929 = vst.msk [vmem:[#allocation2] sm:$0xff] %vm928_vm8, %v922_v25  ;;  %v919_v26 = vpop.permute.xlu1 %918  ;;  %v949_v30 = vpop.permute.xlu0 %948 }
 0x3d7   : > { %v921_v27 = vrot.slane %v919_v26, 4  ;;  %v950_v31 = vrot.slane %v949_v30, 4 }
 0x3d9   : > { %v923_v28 = vsel %vm396_vm3, %v919_v26, %v921_v27  ;;  %v951_v32 = vsel %vm396_vm3, %v949_v30, %v950_v31 }
 0x3da   : > { %930 = vst.msk [vmem:[#allocation2 + $0x8] sm:$0xff] %vm928_vm8, %v923_v28  ;;  %vm952_vm9 = vcmp.ne.s16.totalorder %v951_v32, 0  ;;  %vm979_vm8 = vcmask 1043472   ;;  %v1920_v28 = vld [vmem:[%s2244_s4 + $0x40] sm:$0xff]  }
 0x3db   : > { %vm981_vm11 = vmor %vm980_vm10, %vm979_vm8 }
 0x3dd   : > { %v931_v7 = vld [vmem:[#allocation2] sm:$0xff] }
 0x3de   : > { %955 = vrot.lane.b32.xlu1 %v931_v7, %s1932_s28 }
 0x3e1   : > { %v932_v29 = vld [vmem:[#allocation2 + $0x8] sm:$0xff] }
 0x3e2   : > { %957 = vrot.lane.b32.xlu0 %v932_v29, %s1932_s28 }
 0x450   : > { %v956_v33 = vpop.permute.xlu1 %955 }
 0x451   : > { %v959_v34 = vrot.slane %v956_v33, 4 }
 0x453   : > { %v961_v35 = vsel %vm396_vm3, %v956_v33, %v959_v34 }
 0x454   : > { %v958_v36 = vpop.permute.xlu0 %957  ;;  %v965_v37 = vsel %vm952_vm9, %v931_v7, %v961_v35 }
 0x455   : > { %v960_v38 = vrot.slane %v958_v36, 4  ;;  %969 = vrot.lane.b32.xlu1 %v965_v37, %s1942_s29 }
 0x457   : > { %v962_v39 = vsel %vm396_vm3, %v958_v36, %v960_v38 }
 0x458   : > { %v966_v40 = vsel %vm952_vm9, %v932_v29, %v962_v39 }
 0x459   : > { %971 = vrot.lane.b32.xlu0 %v966_v40, %s1942_s29 }
 0x4c7   : > { %v970_v41 = vpop.permute.xlu1 %969 }
 0x4c8   : > { %v973_v42 = vrot.slane %v970_v41, 4 }
 0x4ca   : > { %v975_v43 = vsel %vm897_vm15, %v973_v42, %v970_v41 }
 0x4cb   : > { %982 = vst.msk [vmem:[#allocation2] sm:$0xff] %vm981_vm11, %v975_v43  ;;  %v972_v44 = vpop.permute.xlu0 %971 }
 0x4cc   : > { %v974_v45 = vrot.slane %v972_v44, 4 }
 0x4ce   : > { %v976_v46 = vsel %vm897_vm15, %v974_v45, %v972_v44 }
 0x4cf   : > { %983 = vst.msk [vmem:[#allocation2 + $0x8] sm:$0xff] %vm981_vm11, %v976_v46 }
 0x4d6   : > { %v1908_v47 = vld [vmem:[#allocation2 + $0x4] ss:$8 sps:$4 sm:$0xff]   ;;  %v1910_v48 = vld [vmem:[#allocation2] ss:$8 sps:$4 sm:$0xff]  }
 0x4d7   : > { %v1911_v49 = vld [vmem:[#allocation2] ss:$8 sps:$4 sm:$0xff]   ;;  %1008 = vrot.lane.b32.xlu0 %v1908_v47, %s1931_s27  ;;  %1006 = vrot.lane.b32.xlu1 %v1910_v48, %s1931_s27 }
 0x4d8   : > { %1815 = vmatpush3.bf16.msra.mxu0 %v1911_v49 }
 0x4d9   : > { %1826 = vmatprep.subr.bf16.mxu0 %v1929_v0 }
 0x4db   : > { %1121 = vrot.lane.b32.xlu0 %v1908_v47, %s1932_s28  ;;  %1119 = vrot.lane.b32.xlu1 %v1910_v48, %s1932_s28  ;;  %s251_s28 = scalar_lea.vmem %s2246_s6, %s1714_s23 }
 0x4dc   : > { %1817 = vmatmul.mubr.msk.bf16.vlgmr.msra.gmra.mxu0 %vm284_vm1, %v1913_v50 }
 0x4dd   : > { %1828 = vmatprep.mubr.msk.bf16.mxu0 %vm1930_vm0, %v1929_v0 }
 0x4df   : > { %1181 = vrot.lane.b32.xlu0 %v1908_v47, %s1933_s7  ;;  %1179 = vrot.lane.b32.xlu1 %v1910_v48, %s1933_s7 }
 0x4e3   : > { %1241 = vrot.lane.b32.xlu0 %v1908_v47, %s1934_s8  ;;  %1239 = vrot.lane.b32.xlu1 %v1910_v48, %s1934_s8 }
 0x4e7   : > { %1301 = vrot.lane.b32.xlu0 %v1908_v47, %s1935_s9  ;;  %1299 = vrot.lane.b32.xlu1 %v1910_v48, %s1935_s9 }
 0x4eb   : > { %1361 = vrot.lane.b32.xlu0 %v1908_v47, %s1936_s10  ;;  %1359 = vrot.lane.b32.xlu1 %v1910_v48, %s1936_s10 }
 0x4ef   : > { %1421 = vrot.lane.b32.xlu0 %v1908_v47, %s1937_s11  ;;  %1419 = vrot.lane.b32.xlu1 %v1910_v48, %s1937_s11 }
 0x4f3   : > { %1481 = vrot.lane.b32.xlu0 %v1908_v47, %s1938_s12  ;;  %1479 = vrot.lane.b32.xlu1 %v1910_v48, %s1938_s12 }
 0x4f7   : > { %1540 = vperm.xlu0 %1884, %v1532_v55   ;;  %1535 = vperm.xlu1 %1885, %v1531_v56  }
 0x4fb   : > { %1887 = vrot.lane.b32.xlu1 %v1886_v57, %s1934_s8  ;;  %1892 = vrot.lane.b32.xlu0 %v1891_v58, %s1934_s8 }
 0x549   : > { %v1009_v1 = vpop.permute.xlu0 %1008  ;;  %v1007_v59 = vpop.permute.xlu1 %1006 }
 0x54a   : > { %v1010_v2 = vsel %vm281_vm2, %v1007_v59, %v1009_v1  ;;  %vm2249_vm2 = vcmask 875520  }
 0x54b   : > { %1809 = vmatpush3.bf16.msra.mxu1 %v1010_v2 }
 0x54c   : > { %1820 = vmatprep.subr.bf16.mxu1 %v1929_v0 }
 0x54d   : > { %v1122_v61 = vpop.permute.xlu0 %1121  ;;  %v1120_v62 = vpop.permute.xlu1 %1119 }
 0x54e   : > { %v1123_v63 = vsel %vm396_vm3, %v1120_v62, %v1122_v61  ;;  %1811 = vmatmul.mubr.msk.bf16.vlgmr.msra.gmra.mxu1 %vm284_vm1, %v1912_v60  ;;  %vm2250_vm3 = vcmask 867328  }
 0x54f   : > { %1821 = vmatpush3.bf16.msra.mxu1 %v1123_v63  ;;  %1822 = vmatprep.mubr.msk.bf16.mxu1 %vm1930_vm0, %v1929_v0 }
 0x550   : > { %1832 = vmatprep.subr.bf16.mxu1 %v1929_v0 }
 0x551   : > { %v1182_v3 = vpop.permute.xlu0 %1181  ;;  %v1180_v4 = vpop.permute.xlu1 %1179 }
 0x552   : > { %v1183_v5 = vsel %vm457_vm4, %v1180_v4, %v1182_v3 }
 0x553   : > { %1827 = vmatpush3.bf16.msra.mxu0 %v1183_v5 }
 0x554   : > { %1838 = vmatprep.subr.bf16.mxu0 %v1929_v0 }
 0x555   : > { %v1242_v9 = vpop.permute.xlu0 %1241  ;;  %v1240_v10 = vpop.permute.xlu1 %1239 }
 0x556   : > { %v1243_v11 = vsel %vm518_vm5, %v1240_v10, %v1242_v9  ;;  %1823 = vmatmul.mubr.msk.bf16.vlgmr.msra.gmra.mxu1 %vm284_vm1, %v1914_v6  ;;  %1829 = vmatmul.mubr.msk.bf16.vlgmr.msra.gmra.mxu0 %vm284_vm1, %v1915_v8 }
 0x557   : > { %1833 = vmatpush3.bf16.msra.mxu1 %v1243_v11  ;;  %1834 = vmatprep.mubr.msk.bf16.mxu1 %vm1930_vm0, %v1929_v0 }
 0x558   : > { %1844 = vmatprep.subr.bf16.mxu1 %v1929_v0  ;;  %1840 = vmatprep.mubr.msk.bf16.mxu0 %vm1930_vm0, %v1929_v0 }
 0x559   : > { %v1302_v12 = vpop.permute.xlu0 %1301  ;;  %v1300_v13 = vpop.permute.xlu1 %1299 }
 0x55a   : > { %v1303_v14 = vsel %vm579_vm6, %v1300_v13, %v1302_v12 }
 0x55b   : > { %1839 = vmatpush3.bf16.msra.mxu0 %v1303_v14 }
 0x55c   : > { %1850 = vmatprep.subr.bf16.mxu0 %v1929_v0 }
 0x55d   : > { %v1362_v17 = vpop.permute.xlu0 %1361  ;;  %v1360_v18 = vpop.permute.xlu1 %1359 }
 0x55e   : > { %v1363_v19 = vsel %vm640_vm7, %v1360_v18, %v1362_v17  ;;  %1835 = vmatmul.mubr.msk.bf16.vlgmr.msra.gmra.mxu1 %vm284_vm1, %v1916_v15  ;;  %1841 = vmatmul.mubr.msk.bf16.vlgmr.msra.gmra.mxu0 %vm284_vm1, %v1917_v16 }
 0x55f   : > { %1845 = vmatpush3.bf16.msra.mxu1 %v1363_v19  ;;  %1846 = vmatprep.mubr.msk.bf16.mxu1 %vm1930_vm0, %v1929_v0 }
 0x560   : > { %1856 = vmatprep.subr.bf16.mxu1 %v1929_v0  ;;  %1852 = vmatprep.mubr.msk.bf16.mxu0 %vm1930_vm0, %v1929_v0 }
 0x561   : > { %v1422_v20 = vpop.permute.xlu0 %1421  ;;  %v1420_v21 = vpop.permute.xlu1 %1419 }
 0x562   : > { %v1423_v22 = vsel %vm2249_vm2, %v1420_v21, %v1422_v20 }
 0x563   : > { %1851 = vmatpush3.bf16.msra.mxu0 %v1423_v22 }
 0x565   : > { %v1482_v25 = vpop.permute.xlu0 %1481  ;;  %v1480_v26 = vpop.permute.xlu1 %1479 }
 0x566   : > { %v1483_v27 = vsel %vm2250_vm3, %v1480_v26, %v1482_v25  ;;  %1847 = vmatmul.mubr.msk.bf16.vlgmr.msra.gmra.mxu1 %vm284_vm1, %v1918_v23  ;;  %1853 = vmatmul.mubr.msk.bf16.vlgmr.msra.gmra.mxu0 %vm284_vm1, %v1919_v24 }
 0x567   : > { %1857 = vmatpush3.bf16.msra.mxu1 %v1483_v27  ;;  %1858 = vmatprep.mubr.msk.bf16.mxu1 %vm1930_vm0, %v1929_v0 }
 0x56e   : > { %1859 = vmatmul.mubr.msk.bf16.vlgmr.msra.gmra.mxu1 %vm284_vm1, %v1920_v28 }
 0x572   : > { %v1536_v57 = vpop.permute.xlu1 %1535  ;;  %v1541_v63 = vpop.permute.xlu0 %1540 }
 0x576   : > { %v1888_v4 = vpop.permute.xlu1 %1887  ;;  %v1893_v15 = vpop.permute.xlu0 %1892 }
 0x577   : > { %v1890_v10 = vunpack.i.h.bf16 %v1888_v4  ;;  %v1889_v11 = vunpack.i.l.bf16 %v1888_v4  ;;  %v1895_v20 = vunpack.i.h.bf16 %v1893_v15  ;;  %v1894_v21 = vunpack.i.l.bf16 %v1893_v15 }
 0x579   : > { %v1564_v18 = vsel %vm518_vm5, %v1889_v11, %v1890_v10  ;;  %v1565_v27 = vsel %vm518_vm5, %v1894_v21, %v1895_v20 }
 0x59c   : > { %v1104_v7 = vpop.f32.mrf.mxu0 }
 0x59e   : > { %v1818_v29 = vpop.f32.mrf.mxu0 }
 0x5a0   : > { %v1107_v30 = vpop.f32.mrf.mxu0 }
 0x5a2   : > { %v1819_v31 = vpop.f32.mrf.mxu0 }
 0x60e   : > { %v1049_v32 = vpop.f32.mrf.mxu1 }
 0x60f   : > { %v1105_v41 = vadd.f32 %v1104_v7, %v1049_v32 }
 0x610   : > { %v1812_v33 = vpop.f32.mrf.mxu1 }
 0x612   : > { %v1052_v34 = vpop.f32.mrf.mxu1 }
 0x613   : > { %v1108_v47 = vadd.f32 %v1107_v30, %v1052_v34 }
 0x614   : > { %v1813_v35 = vpop.f32.mrf.mxu1 }
 0x616   : > { %v1162_v36 = vpop.f32.mrf.mxu1  ;;  %v1222_v37 = vpop.f32.mrf.mxu0 }
 0x617   : > { %v1169_v44 = vadd.f32 %v1162_v36, %v1105_v41 }
 0x618   : > { %v1824_v38 = vpop.f32.mrf.mxu1  ;;  %v1830_v39 = vpop.f32.mrf.mxu0 }
 0x619   : > { %v1229_v50 = vadd.f32 %v1222_v37, %v1169_v44 }
 0x61a   : > { %v1165_v40 = vpop.f32.mrf.mxu1  ;;  %v1225_v0 = vpop.f32.mrf.mxu0 }
 0x61b   : > { %v1170_v51 = vadd.f32 %v1165_v40, %v1108_v47 }
 0x61c   : > { %v1825_v42 = vpop.f32.mrf.mxu1  ;;  %v1831_v43 = vpop.f32.mrf.mxu0 }
 0x61d   : > { %v1230_v58 = vadd.f32 %v1225_v0, %v1170_v51 }
 0x61e   : > { %v1282_v45 = vpop.f32.mrf.mxu1  ;;  %v1342_v46 = vpop.f32.mrf.mxu0 }
 0x61f   : > { %v1289_v54 = vadd.f32 %v1282_v45, %v1229_v50 }
 0x620   : > { %v1836_v48 = vpop.f32.mrf.mxu1  ;;  %v1842_v49 = vpop.f32.mrf.mxu0 }
 0x621   : > { %v1349_v2 = vadd.f32 %v1342_v46, %v1289_v54 }
 0x622   : > { %v1285_v52 = vpop.f32.mrf.mxu1  ;;  %v1345_v53 = vpop.f32.mrf.mxu0 }
 0x623   : > { %v1290_v60 = vadd.f32 %v1285_v52, %v1230_v58 }
 0x624   : > { %v1837_v55 = vpop.f32.mrf.mxu1  ;;  %v1843_v56 = vpop.f32.mrf.mxu0 }
 0x625   : > { %v1350_v8 = vadd.f32 %v1345_v53, %v1290_v60 }
 0x626   : > { %v1402_v1 = vpop.f32.mrf.mxu1  ;;  %v1462_v59 = vpop.f32.mrf.mxu0 }
 0x627   : > { %v1409_v3 = vadd.f32 %v1402_v1, %v1349_v2 }
 0x628   : > { %v1848_v61 = vpop.f32.mrf.mxu1  ;;  %v1854_v62 = vpop.f32.mrf.mxu0 }
 0x629   : > { %v1469_v13 = vadd.f32 %v1462_v59, %v1409_v3 }
 0x62a   : > { %v1405_v5 = vpop.f32.mrf.mxu1  ;;  %v1465_v6 = vpop.f32.mrf.mxu0 }
 0x62b   : > { %v1410_v14 = vadd.f32 %v1405_v5, %v1350_v8 }
 0x62c   : > { %v1849_v9 = vpop.f32.mrf.mxu1  ;;  %v1855_v12 = vpop.f32.mrf.mxu0 }
 0x62d   : > { %v1470_v22 = vadd.f32 %v1465_v6, %v1410_v14 }
 0x62e   : > { %v1522_v16 = vpop.f32.mrf.mxu1 }
 0x62f   : > { %v1529_v17 = vadd.f32 %v1522_v16, %v1469_v13 }
 0x630   : > { %v1860_v19 = vpop.f32.mrf.mxu1 }
 0x631   : > { %v1543_v23 = vadd.f32 %v1536_v57, %v1529_v17 }
 0x632   : > { %v1525_v24 = vpop.f32.mrf.mxu1 }
 0x633   : > { %v1568_v25 = vadd.f32 %v1564_v18, %v1543_v23  ;;  %v1530_v26 = vadd.f32 %v1525_v24, %v1470_v22 }
 0x634   : > { %v1861_v28 = vpop.f32.mrf.mxu1 }
 0x635   : > { %1570 = vst [vmem:[%s251_s28] sm:$0xff] %v1568_v25  ;;  %v1544_v7 = vadd.f32 %v1541_v63, %v1530_v26 }
 0x637   : > { %v1569_v29 = vadd.f32 %v1565_v27, %v1544_v7 }
 0x639   : > { %1571 = vst [vmem:[%s251_s28 + $0x8] sm:$0xff] %v1569_v29 }
 0x63a PF: > { %s16_s21 = sadd.s32 1, %s1927_s21  }
 0x63b   : > { %p13_p4 = scmp.ge.s32.totalorder %s16_s21, 4  }
 0x63d   :  { %15 = sbr.rel (!%p13_p4) target bundleno = 1 (0x1), region = 90 }

</bundles_post_ra>
